<compile_context>
chip_gen: v7x
topology: tpu7x:2x2x1
jax: 0.10.0
libtpu: 0.0.40
codegen_flags: <defaults>
</compile_context>

<pallas_src>
import numpy as np
import jax
import jax.numpy as jnp
from jax.experimental import pallas as pl
from jax.experimental.pallas import tpu as pltpu

# ---------------- config (matches module defaults) ----------------
NUM_LEVELS = 8
FEATS_PER_LEVEL = 2
BASE_RES = 16
MAX_RES = 512
LOG2_HASHMAP_SIZE = 17
N_NEURONS = 16
N_LAYERS = 3          # -> 2 hidden layers in tcnn terms
HASHMAP_SIZE = 2 ** LOG2_HASHMAP_SIZE
GROWTH = float(np.exp((np.log(MAX_RES) - np.log(BASE_RES)) / (NUM_LEVELS - 1)))
HG_FEATS = NUM_LEVELS * FEATS_PER_LEVEL      # 16
SH_FEATS = 16                                # degree 4
MLP_IN = HG_FEATS + SH_FEATS                 # 32
OUT_PAD = 16                                 # tcnn pads n_output_dims=1 -> 16
DIR_PAD = 8                                  # sublane-pad the (3, N) dirs to 8 rows

ROW_TILE = 1024   # samples per grid step on the lane axis (sweep 512-2048)


# ---------------- Pallas kernel: SH encoding + fused MLP + trunc_exp ----------------
def visibility_mlp_kernel(hg_ref, dir_ref, w0hg_ref, w0sh_ref, w1t_ref, w2r_ref,
                          out_ref, sh_ref):
    # dir_ref rows 0..2 hold tcnn-shifted directions in [0,1]; SH internally maps to [-1,1].
    d = dir_ref[...] * 2.0 - 1.0
    x = d[0:1, :]
    y = d[1:2, :]
    z = d[2:3, :]
    xx, yy, zz = x * x, y * y, z * z
    xy, yz, xz = x * y, y * z, x * z

    # Spherical harmonics, degree 4 (16 coefficients, tcnn ordering). Each term is a
    # lane-dense (1, ROW_TILE) row; stage them into a (16, ROW_TILE) VMEM tile so the
    # whole SH contribution becomes a single K=16 MXU matmul.
    sh_terms = [
        jnp.full_like(x, 0.28209479177387814),
        -0.48860251190291987 * y,
        0.48860251190291987 * z,
        -0.48860251190291987 * x,
        1.0925484305920792 * xy,
        -1.0925484305920792 * yz,
        0.94617469575755997 * zz - 0.31539156525251999,
        -1.0925484305920792 * xz,
        0.54627421529603959 * (xx - yy),
        0.59004358992664352 * y * (-3.0 * xx + yy),
        2.8906114426405538 * xy * z,
        0.45704579946446572 * y * (1.0 - 5.0 * zz),
        0.3731763325901154 * z * (5.0 * zz - 3.0),
        0.45704579946446572 * x * (1.0 - 5.0 * zz),
        1.4453057213202769 * z * (xx - yy),
        0.59004358992664352 * x * (-xx + 3.0 * yy),
    ]
    for k, term in enumerate(sh_terms):
        sh_ref[k:k + 1, :] = term

    # Layer 0: W0^T @ [hg; sh] with samples on the lane axis (two K=16 MXU matmuls).
    h = jnp.dot(w0hg_ref[...], hg_ref[...], preferred_element_type=jnp.float32)
    h = h + jnp.dot(w0sh_ref[...], sh_ref[...], preferred_element_type=jnp.float32)
    h = jnp.maximum(h, 0.0)

    # Hidden layer.
    h = jnp.maximum(jnp.dot(w1t_ref[...], h, preferred_element_type=jnp.float32), 0.0)

    # Output layer: only the real output column of w2 (rows 1..7 of w2r are zero pad).
    o = jnp.dot(w2r_ref[...], h, preferred_element_type=jnp.float32)   # (8, ROW_TILE)
    out_ref[...] = jnp.exp(o[0:1, :])                                  # trunc_exp fwd, real row only


def run_visibility_mlp(hg_t, dirs_t, w0, w1, w2):
    """hg_t: (16, N) hashgrid feats; dirs_t: (3, N) tcnn-shifted dirs. Returns (N,) transmittance."""
    n = hg_t.shape[1]
    n_pad = pl.cdiv(n, ROW_TILE) * ROW_TILE
    hg_t = jnp.pad(hg_t, ((0, 0), (0, n_pad - n)))
    dirs_t = jnp.pad(dirs_t, ((0, DIR_PAD - dirs_t.shape[0]), (0, n_pad - n)))

    # Transposed weights so every layer is W^T @ X (samples on lanes).
    w0hg = w0[:HG_FEATS, :].T                    # (16, 16)
    w0sh = w0[HG_FEATS:, :].T                    # (16, 16)
    w1t = w1.T                                   # (16, 16)
    # Only column 0 of the tcnn-padded output layer is real; drop the padding entirely.
    w2r = jnp.zeros((8, N_NEURONS), jnp.float32).at[0].set(w2[:, 0])

    out = pl.pallas_call(
        visibility_mlp_kernel,
        out_shape=jax.ShapeDtypeStruct((1, n_pad), jnp.float32),
        grid_spec=pltpu.PrefetchScalarGridSpec(
            num_scalar_prefetch=0,
            grid=(n_pad // ROW_TILE,),
            in_specs=[
                pl.BlockSpec((HG_FEATS, ROW_TILE), lambda i: (0, i)),
                pl.BlockSpec((DIR_PAD, ROW_TILE), lambda i: (0, i)),
                # Constant block index -> not re-DMAed across grid steps.
                pl.BlockSpec((N_NEURONS, N_NEURONS), lambda i: (0, 0)),
                pl.BlockSpec((N_NEURONS, N_NEURONS), lambda i: (0, 0)),
                pl.BlockSpec((N_NEURONS, N_NEURONS), lambda i: (0, 0)),
                pl.BlockSpec((8, N_NEURONS), lambda i: (0, 0)),
            ],
            out_specs=pl.BlockSpec((1, ROW_TILE), lambda i: (0, i)),
            scratch_shapes=[pltpu.VMEM((SH_FEATS, ROW_TILE), jnp.float32)],
        ),
        compiler_params=pltpu.CompilerParams(dimension_semantics=("parallel",)),
    )(hg_t, dirs_t, w0hg, w0sh, w1t, w2r)
    return out[0, :n]


# ---------------- plain-JAX glue ----------------
def scene_contraction(x):
    # nerfstudio SceneContraction (L2 norm): identity inside unit ball, contract outside.
    norm = jnp.linalg.norm(x, axis=-1, keepdims=True)
    safe = jnp.maximum(norm, 1e-12)
    contracted = (2.0 - 1.0 / safe) * (x / safe)
    return jnp.where(norm <= 1.0, x, contracted)


def shift_directions_for_tcnn(d):
    return (d + 1.0) / 2.0


# TODO(synk): the hash-grid lookup (data-dependent gather + trilinear interpolation over a
# 2^17-entry table per level) stays in plain JAX; fusing it into the kernel with a
# VMEM-resident table needs an in-kernel dynamic gather that is not cleanly expressible here.
def hashgrid_encode_t(positions, table):
    # positions: (N, 3) in [0, 1];  table: (NUM_LEVELS, HASHMAP_SIZE, FEATS_PER_LEVEL)
    # Returns (HG_FEATS, N) = transposed features, ready for the samples-on-lanes kernel.
    n = positions.shape[0]
    primes = (np.uint32(1), np.uint32(2654435761), np.uint32(805459861))
    feats = []
    for level in range(NUM_LEVELS):
        scale = BASE_RES * (GROWTH ** level) - 1.0
        res = int(np.ceil(scale)) + 1
        pos = positions * scale + 0.5
        pos_floor = jnp.floor(pos)
        w = pos - pos_floor
        pos_int = pos_floor.astype(jnp.uint32)
        level_table = table[level]
        acc = jnp.zeros((n, FEATS_PER_LEVEL), dtype=jnp.float32)
        dense = (res ** 3) <= HASHMAP_SIZE
        for corner in range(8):
            offs = np.array([(corner >> k) & 1 for k in range(3)], dtype=np.uint32)
            cidx = pos_int + jnp.asarray(offs, dtype=jnp.uint32)
            if dense:
                stride = jnp.asarray([1, res, res * res], dtype=jnp.uint32)
                idx = jnp.sum(cidx * stride, axis=-1) % np.uint32(HASHMAP_SIZE)
            else:
                idx = (cidx[:, 0] * primes[0]) ^ (cidx[:, 1] * primes[1]) ^ (cidx[:, 2] * primes[2])
                idx = idx % np.uint32(HASHMAP_SIZE)
            offs_f = jnp.asarray(offs, dtype=jnp.float32)
            weight = jnp.prod(jnp.where(offs_f == 1.0, w, 1.0 - w), axis=-1, keepdims=True)
            acc = acc + weight * level_table[idx]
        feats.append(acc)
    return jnp.concatenate(feats, axis=-1).T  # (16, N)


def visibility_forward(positions, directions, params):
    """positions, directions: (..., 3). Returns pred_transmittance: (..., 1)."""
    out_shape = directions.shape[:-1]
    # spatial_distortion path of the module
    pos = scene_contraction(positions)
    pos = (pos + 2.0) / 4.0
    pos_flat = pos.reshape(-1, 3)
    dirs_flat = shift_directions_for_tcnn(directions).reshape(-1, 3)

    hg_t = hashgrid_encode_t(pos_flat, params["hash_table"])
    pred = run_visibility_mlp(hg_t.astype(jnp.float32),
                              dirs_flat.T.astype(jnp.float32),
                              params["w0"], params["w1"], params["w2"])
    return pred.reshape(*out_shape, 1).astype(directions.dtype)


def init_params(key):
    k_tab, k0, k1, k2 = jax.random.split(key, 4)
    hash_table = jax.random.uniform(
        k_tab, (NUM_LEVELS, HASHMAP_SIZE, FEATS_PER_LEVEL),
        minval=-1e-4, maxval=1e-4, dtype=jnp.float32)
    w0 = jax.random.normal(k0, (MLP_IN, N_NEURONS), jnp.float32) * np.sqrt(2.0 / MLP_IN)
    w1 = jax.random.normal(k1, (N_NEURONS, N_NEURONS), jnp.float32) * np.sqrt(2.0 / N_NEURONS)
    w2 = jax.random.normal(k2, (N_NEURONS, OUT_PAD), jnp.float32) * np.sqrt(2.0 / N_NEURONS)
    # tcnn pads n_output_dims 1 -> 16: only column 0 is the real output.
    return {"hash_table": hash_table, "w0": w0, "w1": w1, "w2": w2}


if __name__ == "__main__":
    key = jax.random.PRNGKey(0)
    k_param, k_pos, k_dir = jax.random.split(key, 3)
    params = init_params(k_param)

    # 16 rays x 128 samples = 2048 flattened samples -> 2 grid steps of ROW_TILE=1024
    # (keeps >=2 even grid steps so both v7x TensorCores get work).
    num_rays, samples_per_ray = 16, 128
    positions = jax.random.uniform(k_pos, (num_rays, samples_per_ray, 3),
                                   minval=-1.5, maxval=1.5, dtype=jnp.float32)
    raw_dirs = jax.random.normal(k_dir, (num_rays, samples_per_ray, 3), jnp.float32)
    directions = raw_dirs / jnp.linalg.norm(raw_dirs, axis=-1, keepdims=True)

    pred_transmittance = visibility_forward(positions, directions, params)
    pred_transmittance = jax.block_until_ready(pred_transmittance)

    assert pred_transmittance.shape == (num_rays, samples_per_ray, 1)
    assert pred_transmittance.dtype == directions.dtype
    assert bool(jnp.all(jnp.isfinite(pred_transmittance)))
    assert bool(jnp.all(pred_transmittance > 0.0))   # exp output
    print("KERNEL_OK")
</pallas_src>

<mosaic_0001>
module attributes {stable_mosaic.version = 11 : i64} {
  func.func @visibility_mlp_kernel(%arg0: i32, %arg1: memref<16x1024xf32, #tpu.memory_space<vmem>>, %arg2: memref<8x1024xf32, #tpu.memory_space<vmem>>, %arg3: memref<16x16xf32, #tpu.memory_space<vmem>>, %arg4: memref<16x16xf32, #tpu.memory_space<vmem>>, %arg5: memref<16x16xf32, #tpu.memory_space<vmem>>, %arg6: memref<8x16xf32, #tpu.memory_space<vmem>>, %arg7: memref<1x1024xf32, #tpu.memory_space<vmem>>, %arg8: memref<16x1024xf32, #tpu.memory_space<vmem>>) attributes {dimension_semantics = [#tpu.dimension_semantics<parallel>], iteration_bounds = array<i64: 2>, scalar_prefetch = 0 : i64, scratch_operands = 1 : i64, tpu.core_type = #tpu.core_type<tc>, window_params = [{transform_indices = @transform_0, window_bounds = array<i64: 16, 1024>}, {transform_indices = @transform_1, window_bounds = array<i64: 8, 1024>}, {pipeline_mode = #tpu.pipeline_mode<synchronous>, transform_indices = @transform_2, window_bounds = array<i64: 16, 16>}, {pipeline_mode = #tpu.pipeline_mode<synchronous>, transform_indices = @transform_3, window_bounds = array<i64: 16, 16>}, {pipeline_mode = #tpu.pipeline_mode<synchronous>, transform_indices = @transform_4, window_bounds = array<i64: 16, 16>}, {pipeline_mode = #tpu.pipeline_mode<synchronous>, transform_indices = @transform_5, window_bounds = array<i64: 8, 16>}, {transform_indices = @transform_6, window_bounds = array<i64: 1, 1024>}]} {
    %c0 = arith.constant 0 : index
    %c0_0 = arith.constant 0 : index
    %0 = vector.load %arg2[%c0, %c0_0] : memref<8x1024xf32, #tpu.memory_space<vmem>>, vector<8x1024xf32>
    %cst = arith.constant 2.000000e+00 : f32
    %1 = vector.broadcast %cst : f32 to vector<8x1024xf32>
    %2 = arith.mulf %0, %1 : vector<8x1024xf32>
    %cst_1 = arith.constant 1.000000e+00 : f32
    %3 = vector.broadcast %cst_1 : f32 to vector<8x1024xf32>
    %4 = arith.subf %2, %3 : vector<8x1024xf32>
    %5 = vector.extract_strided_slice %4 {offsets = [0, 0], sizes = [1, 1024], strides = [1, 1]} : vector<8x1024xf32> to vector<1x1024xf32>
    %6 = vector.extract_strided_slice %4 {offsets = [1, 0], sizes = [1, 1024], strides = [1, 1]} : vector<8x1024xf32> to vector<1x1024xf32>
    %7 = vector.extract_strided_slice %4 {offsets = [2, 0], sizes = [1, 1024], strides = [1, 1]} : vector<8x1024xf32> to vector<1x1024xf32>
    %8 = arith.mulf %5, %5 : vector<1x1024xf32>
    %9 = arith.mulf %6, %6 : vector<1x1024xf32>
    %10 = arith.mulf %7, %7 : vector<1x1024xf32>
    %11 = arith.mulf %5, %6 : vector<1x1024xf32>
    %12 = arith.mulf %6, %7 : vector<1x1024xf32>
    %13 = arith.mulf %5, %7 : vector<1x1024xf32>
    %cst_2 = arith.constant 0.282094806 : f32
    %14 = vector.broadcast %cst_2 : f32 to vector<1x1024xf32>
    %cst_3 = arith.constant -0.488602519 : f32
    %15 = vector.broadcast %cst_3 : f32 to vector<1x1024xf32>
    %16 = arith.mulf %15, %6 : vector<1x1024xf32>
    %cst_4 = arith.constant 0.488602519 : f32
    %17 = vector.broadcast %cst_4 : f32 to vector<1x1024xf32>
    %18 = arith.mulf %17, %7 : vector<1x1024xf32>
    %cst_5 = arith.constant -0.488602519 : f32
    %19 = vector.broadcast %cst_5 : f32 to vector<1x1024xf32>
    %20 = arith.mulf %19, %5 : vector<1x1024xf32>
    %cst_6 = arith.constant 1.09254849 : f32
    %21 = vector.broadcast %cst_6 : f32 to vector<1x1024xf32>
    %22 = arith.mulf %21, %11 : vector<1x1024xf32>
    %cst_7 = arith.constant -1.09254849 : f32
    %23 = vector.broadcast %cst_7 : f32 to vector<1x1024xf32>
    %24 = arith.mulf %23, %12 : vector<1x1024xf32>
    %cst_8 = arith.constant 0.946174681 : f32
    %25 = vector.broadcast %cst_8 : f32 to vector<1x1024xf32>
    %26 = arith.mulf %25, %10 : vector<1x1024xf32>
    %cst_9 = arith.constant 0.31539157 : f32
    %27 = vector.broadcast %cst_9 : f32 to vector<1x1024xf32>
    %28 = arith.subf %26, %27 : vector<1x1024xf32>
    %cst_10 = arith.constant -1.09254849 : f32
    %29 = vector.broadcast %cst_10 : f32 to vector<1x1024xf32>
    %30 = arith.mulf %29, %13 : vector<1x1024xf32>
    %31 = arith.subf %8, %9 : vector<1x1024xf32>
    %cst_11 = arith.constant 0.546274245 : f32
    %32 = vector.broadcast %cst_11 : f32 to vector<1x1024xf32>
    %33 = arith.mulf %32, %31 : vector<1x1024xf32>
    %cst_12 = arith.constant 0.590043604 : f32
    %34 = vector.broadcast %cst_12 : f32 to vector<1x1024xf32>
    %35 = arith.mulf %34, %6 : vector<1x1024xf32>
    %cst_13 = arith.constant -3.000000e+00 : f32
    %36 = vector.broadcast %cst_13 : f32 to vector<1x1024xf32>
    %37 = arith.mulf %36, %8 : vector<1x1024xf32>
    %38 = arith.addf %37, %9 : vector<1x1024xf32>
    %39 = arith.mulf %35, %38 : vector<1x1024xf32>
    %cst_14 = arith.constant 2.89061141 : f32
    %40 = vector.broadcast %cst_14 : f32 to vector<1x1024xf32>
    %41 = arith.mulf %40, %11 : vector<1x1024xf32>
    %42 = arith.mulf %41, %7 : vector<1x1024xf32>
    %cst_15 = arith.constant 0.457045794 : f32
    %43 = vector.broadcast %cst_15 : f32 to vector<1x1024xf32>
    %44 = arith.mulf %43, %6 : vector<1x1024xf32>
    %cst_16 = arith.constant 5.000000e+00 : f32
    %45 = vector.broadcast %cst_16 : f32 to vector<1x1024xf32>
    %46 = arith.mulf %45, %10 : vector<1x1024xf32>
    %cst_17 = arith.constant 1.000000e+00 : f32
    %47 = vector.broadcast %cst_17 : f32 to vector<1x1024xf32>
    %48 = arith.subf %47, %46 : vector<1x1024xf32>
    %49 = arith.mulf %44, %48 : vector<1x1024xf32>
    %cst_18 = arith.constant 0.373176336 : f32
    %50 = vector.broadcast %cst_18 : f32 to vector<1x1024xf32>
    %51 = arith.mulf %50, %7 : vector<1x1024xf32>
    %cst_19 = arith.constant 5.000000e+00 : f32
    %52 = vector.broadcast %cst_19 : f32 to vector<1x1024xf32>
    %53 = arith.mulf %52, %10 : vector<1x1024xf32>
    %cst_20 = arith.constant 3.000000e+00 : f32
    %54 = vector.broadcast %cst_20 : f32 to vector<1x1024xf32>
    %55 = arith.subf %53, %54 : vector<1x1024xf32>
    %56 = arith.mulf %51, %55 : vector<1x1024xf32>
    %cst_21 = arith.constant 0.457045794 : f32
    %57 = vector.broadcast %cst_21 : f32 to vector<1x1024xf32>
    %58 = arith.mulf %57, %5 : vector<1x1024xf32>
    %cst_22 = arith.constant 5.000000e+00 : f32
    %59 = vector.broadcast %cst_22 : f32 to vector<1x1024xf32>
    %60 = arith.mulf %59, %10 : vector<1x1024xf32>
    %cst_23 = arith.constant 1.000000e+00 : f32
    %61 = vector.broadcast %cst_23 : f32 to vector<1x1024xf32>
    %62 = arith.subf %61, %60 : vector<1x1024xf32>
    %63 = arith.mulf %58, %62 : vector<1x1024xf32>
    %cst_24 = arith.constant 1.44530571 : f32
    %64 = vector.broadcast %cst_24 : f32 to vector<1x1024xf32>
    %65 = arith.mulf %64, %7 : vector<1x1024xf32>
    %66 = arith.subf %8, %9 : vector<1x1024xf32>
    %67 = arith.mulf %65, %66 : vector<1x1024xf32>
    %cst_25 = arith.constant 0.590043604 : f32
    %68 = vector.broadcast %cst_25 : f32 to vector<1x1024xf32>
    %69 = arith.mulf %68, %5 : vector<1x1024xf32>
    %cst_26 = arith.constant 0.000000e+00 : f32
    %70 = vector.broadcast %cst_26 : f32 to vector<1x1024xf32>
    %71 = arith.subf %70, %8 : vector<1x1024xf32>
    %cst_27 = arith.constant 3.000000e+00 : f32
    %72 = vector.broadcast %cst_27 : f32 to vector<1x1024xf32>
    %73 = arith.mulf %72, %9 : vector<1x1024xf32>
    %74 = arith.addf %71, %73 : vector<1x1024xf32>
    %75 = arith.mulf %69, %74 : vector<1x1024xf32>
    %c0_28 = arith.constant 0 : index
    %c0_29 = arith.constant 0 : index
    %76 = vector.load %arg8[%c0_28, %c0_29] : memref<16x1024xf32, #tpu.memory_space<vmem>>, vector<1x1024xf32>
    tpu.vector_store %arg8[%c0_28, %c0_29], %14 {strides = array<i32>} : memref<16x1024xf32, #tpu.memory_space<vmem>>, vector<1x1024xf32>,
    %c1 = arith.constant 1 : index
    %c0_30 = arith.constant 0 : index
    %77 = vector.load %arg8[%c1, %c0_30] : memref<16x1024xf32, #tpu.memory_space<vmem>>, vector<1x1024xf32>
    tpu.vector_store %arg8[%c1, %c0_30], %16 {strides = array<i32>} : memref<16x1024xf32, #tpu.memory_space<vmem>>, vector<1x1024xf32>,
    %c2 = arith.constant 2 : index
    %c0_31 = arith.constant 0 : index
    %78 = vector.load %arg8[%c2, %c0_31] : memref<16x1024xf32, #tpu.memory_space<vmem>>, vector<1x1024xf32>
    tpu.vector_store %arg8[%c2, %c0_31], %18 {strides = array<i32>} : memref<16x1024xf32, #tpu.memory_space<vmem>>, vector<1x1024xf32>,
    %c3 = arith.constant 3 : index
    %c0_32 = arith.constant 0 : index
    %79 = vector.load %arg8[%c3, %c0_32] : memref<16x1024xf32, #tpu.memory_space<vmem>>, vector<1x1024xf32>
    tpu.vector_store %arg8[%c3, %c0_32], %20 {strides = array<i32>} : memref<16x1024xf32, #tpu.memory_space<vmem>>, vector<1x1024xf32>,
    %c4 = arith.constant 4 : index
    %c0_33 = arith.constant 0 : index
    %80 = vector.load %arg8[%c4, %c0_33] : memref<16x1024xf32, #tpu.memory_space<vmem>>, vector<1x1024xf32>
    tpu.vector_store %arg8[%c4, %c0_33], %22 {strides = array<i32>} : memref<16x1024xf32, #tpu.memory_space<vmem>>, vector<1x1024xf32>,
    %c5 = arith.constant 5 : index
    %c0_34 = arith.constant 0 : index
    %81 = vector.load %arg8[%c5, %c0_34] : memref<16x1024xf32, #tpu.memory_space<vmem>>, vector<1x1024xf32>
    tpu.vector_store %arg8[%c5, %c0_34], %24 {strides = array<i32>} : memref<16x1024xf32, #tpu.memory_space<vmem>>, vector<1x1024xf32>,
    %c6 = arith.constant 6 : index
    %c0_35 = arith.constant 0 : index
    %82 = vector.load %arg8[%c6, %c0_35] : memref<16x1024xf32, #tpu.memory_space<vmem>>, vector<1x1024xf32>
    tpu.vector_store %arg8[%c6, %c0_35], %28 {strides = array<i32>} : memref<16x1024xf32, #tpu.memory_space<vmem>>, vector<1x1024xf32>,
    %c7 = arith.constant 7 : index
    %c0_36 = arith.constant 0 : index
    %83 = vector.load %arg8[%c7, %c0_36] : memref<16x1024xf32, #tpu.memory_space<vmem>>, vector<1x1024xf32>
    tpu.vector_store %arg8[%c7, %c0_36], %30 {strides = array<i32>} : memref<16x1024xf32, #tpu.memory_space<vmem>>, vector<1x1024xf32>,
    %c8 = arith.constant 8 : index
    %c0_37 = arith.constant 0 : index
    %84 = vector.load %arg8[%c8, %c0_37] : memref<16x1024xf32, #tpu.memory_space<vmem>>, vector<1x1024xf32>
    tpu.vector_store %arg8[%c8, %c0_37], %33 {strides = array<i32>} : memref<16x1024xf32, #tpu.memory_space<vmem>>, vector<1x1024xf32>,
    %c9 = arith.constant 9 : index
    %c0_38 = arith.constant 0 : index
    %85 = vector.load %arg8[%c9, %c0_38] : memref<16x1024xf32, #tpu.memory_space<vmem>>, vector<1x1024xf32>
    tpu.vector_store %arg8[%c9, %c0_38], %39 {strides = array<i32>} : memref<16x1024xf32, #tpu.memory_space<vmem>>, vector<1x1024xf32>,
    %c10 = arith.constant 10 : index
    %c0_39 = arith.constant 0 : index
    %86 = vector.load %arg8[%c10, %c0_39] : memref<16x1024xf32, #tpu.memory_space<vmem>>, vector<1x1024xf32>
    tpu.vector_store %arg8[%c10, %c0_39], %42 {strides = array<i32>} : memref<16x1024xf32, #tpu.memory_space<vmem>>, vector<1x1024xf32>,
    %c11 = arith.constant 11 : index
    %c0_40 = arith.constant 0 : index
    %87 = vector.load %arg8[%c11, %c0_40] : memref<16x1024xf32, #tpu.memory_space<vmem>>, vector<1x1024xf32>
    tpu.vector_store %arg8[%c11, %c0_40], %49 {strides = array<i32>} : memref<16x1024xf32, #tpu.memory_space<vmem>>, vector<1x1024xf32>,
    %c12 = arith.constant 12 : index
    %c0_41 = arith.constant 0 : index
    %88 = vector.load %arg8[%c12, %c0_41] : memref<16x1024xf32, #tpu.memory_space<vmem>>, vector<1x1024xf32>
    tpu.vector_store %arg8[%c12, %c0_41], %56 {strides = array<i32>} : memref<16x1024xf32, #tpu.memory_space<vmem>>, vector<1x1024xf32>,
    %c13 = arith.constant 13 : index
    %c0_42 = arith.constant 0 : index
    %89 = vector.load %arg8[%c13, %c0_42] : memref<16x1024xf32, #tpu.memory_space<vmem>>, vector<1x1024xf32>
    tpu.vector_store %arg8[%c13, %c0_42], %63 {strides = array<i32>} : memref<16x1024xf32, #tpu.memory_space<vmem>>, vector<1x1024xf32>,
    %c14 = arith.constant 14 : index
    %c0_43 = arith.constant 0 : index
    %90 = vector.load %arg8[%c14, %c0_43] : memref<16x1024xf32, #tpu.memory_space<vmem>>, vector<1x1024xf32>
    tpu.vector_store %arg8[%c14, %c0_43], %67 {strides = array<i32>} : memref<16x1024xf32, #tpu.memory_space<vmem>>, vector<1x1024xf32>,
    %c15 = arith.constant 15 : index
    %c0_44 = arith.constant 0 : index
    %91 = vector.load %arg8[%c15, %c0_44] : memref<16x1024xf32, #tpu.memory_space<vmem>>, vector<1x1024xf32>
    tpu.vector_store %arg8[%c15, %c0_44], %75 {strides = array<i32>} : memref<16x1024xf32, #tpu.memory_space<vmem>>, vector<1x1024xf32>,
    %c0_45 = arith.constant 0 : index
    %c0_46 = arith.constant 0 : index
    %92 = vector.load %arg3[%c0_45, %c0_46] : memref<16x16xf32, #tpu.memory_space<vmem>>, vector<16x16xf32>
    %c0_47 = arith.constant 0 : index
    %c0_48 = arith.constant 0 : index
    %93 = vector.load %arg1[%c0_47, %c0_48] : memref<16x1024xf32, #tpu.memory_space<vmem>>, vector<16x1024xf32>
    %cst_49 = arith.constant dense<0.000000e+00> : vector<16x1024xf32>
    %94 = tpu.matmul %92, %93, %cst_49 {dimension_numbers = #tpu.dot_dimension_numbers<[1], [0], [0], [1], [0, 0, 1, 1], [], []>} : vector<16x16xf32>, vector<16x1024xf32>, vector<16x1024xf32> -> vector<16x1024xf32>
    %c0_50 = arith.constant 0 : index
    %c0_51 = arith.constant 0 : index
    %95 = vector.load %arg4[%c0_50, %c0_51] : memref<16x16xf32, #tpu.memory_space<vmem>>, vector<16x16xf32>
    %c0_52 = arith.constant 0 : index
    %c0_53 = arith.constant 0 : index
    %96 = vector.load %arg8[%c0_52, %c0_53] : memref<16x1024xf32, #tpu.memory_space<vmem>>, vector<16x1024xf32>
    %cst_54 = arith.constant dense<0.000000e+00> : vector<16x1024xf32>
    %97 = tpu.matmul %95, %96, %cst_54 {dimension_numbers = #tpu.dot_dimension_numbers<[1], [0], [0], [1], [0, 0, 1, 1], [], []>} : vector<16x16xf32>, vector<16x1024xf32>, vector<16x1024xf32> -> vector<16x1024xf32>
    %98 = arith.addf %94, %97 : vector<16x1024xf32>
    %cst_55 = arith.constant 0.000000e+00 : f32
    %99 = vector.broadcast %cst_55 : f32 to vector<16x1024xf32>
    %100 = arith.maximumf %98, %99 : vector<16x1024xf32>
    %c0_56 = arith.constant 0 : index
    %c0_57 = arith.constant 0 : index
    %101 = vector.load %arg5[%c0_56, %c0_57] : memref<16x16xf32, #tpu.memory_space<vmem>>, vector<16x16xf32>
    %cst_58 = arith.constant dense<0.000000e+00> : vector<16x1024xf32>
    %102 = tpu.matmul %101, %100, %cst_58 {dimension_numbers = #tpu.dot_dimension_numbers<[1], [0], [0], [1], [0, 0, 1, 1], [], []>} : vector<16x16xf32>, vector<16x1024xf32>, vector<16x1024xf32> -> vector<16x1024xf32>
    %cst_59 = arith.constant 0.000000e+00 : f32
    %103 = vector.broadcast %cst_59 : f32 to vector<16x1024xf32>
    %104 = arith.maximumf %102, %103 : vector<16x1024xf32>
    %c0_60 = arith.constant 0 : index
    %c0_61 = arith.constant 0 : index
    %105 = vector.load %arg6[%c0_60, %c0_61] : memref<8x16xf32, #tpu.memory_space<vmem>>, vector<8x16xf32>
    %cst_62 = arith.constant dense<0.000000e+00> : vector<8x1024xf32>
    %106 = tpu.matmul %105, %104, %cst_62 {dimension_numbers = #tpu.dot_dimension_numbers<[1], [0], [0], [1], [0, 0, 1, 1], [], []>} : vector<8x16xf32>, vector<16x1024xf32>, vector<8x1024xf32> -> vector<8x1024xf32>
    %107 = vector.extract_strided_slice %106 {offsets = [0, 0], sizes = [1, 1024], strides = [1, 1]} : vector<8x1024xf32> to vector<1x1024xf32>
    %108 = math.exp %107 : vector<1x1024xf32>
    %c0_63 = arith.constant 0 : index
    %c0_64 = arith.constant 0 : index
    %109 = vector.load %arg7[%c0_63, %c0_64] : memref<1x1024xf32, #tpu.memory_space<vmem>>, vector<1x1024xf32>
    tpu.vector_store %arg7[%c0_63, %c0_64], %108 {strides = array<i32>} : memref<1x1024xf32, #tpu.memory_space<vmem>>, vector<1x1024xf32>,
    return
  }
  func.func @transform_0(%arg0: i32) -> (i32, i32) {
    %c0_i32 = arith.constant 0 : i32
    %c0_i32_0 = arith.constant 0 : i32
    return %c0_i32, %arg0 : i32, i32
  }
  func.func @transform_1(%arg0: i32) -> (i32, i32) {
    %c0_i32 = arith.constant 0 : i32
    %c0_i32_0 = arith.constant 0 : i32
    return %c0_i32, %arg0 : i32, i32
  }
  func.func @transform_2(%arg0: i32) -> (i32, i32) {
    %c0_i32 = arith.constant 0 : i32
    %c0_i32_0 = arith.constant 0 : i32
    %c0_i32_1 = arith.constant 0 : i32
    return %c0_i32, %c0_i32_0 : i32, i32
  }
  func.func @transform_3(%arg0: i32) -> (i32, i32) {
    %c0_i32 = arith.constant 0 : i32
    %c0_i32_0 = arith.constant 0 : i32
    %c0_i32_1 = arith.constant 0 : i32
    return %c0_i32, %c0_i32_0 : i32, i32
  }
  func.func @transform_4(%arg0: i32) -> (i32, i32) {
    %c0_i32 = arith.constant 0 : i32
    %c0_i32_0 = arith.constant 0 : i32
    %c0_i32_1 = arith.constant 0 : i32
    return %c0_i32, %c0_i32_0 : i32, i32
  }
  func.func @transform_5(%arg0: i32) -> (i32, i32) {
    %c0_i32 = arith.constant 0 : i32
    %c0_i32_0 = arith.constant 0 : i32
    %c0_i32_1 = arith.constant 0 : i32
    return %c0_i32, %c0_i32_0 : i32, i32
  }
  func.func @transform_6(%arg0: i32) -> (i32, i32) {
    %c0_i32 = arith.constant 0 : i32
    %c0_i32_0 = arith.constant 0 : i32
    return %c0_i32, %arg0 : i32, i32
  }
}

</mosaic_0001>

<bundles_post_ra>
// kernel: tpu_custom_call.1
= control target key start
LH: loop header
LB: loop body
LE: loop exit
PB: predicated region body
PF: predicated region fallthrough
CT: control target
= control target key end

     0   :  { %s4924_s0 = inlined_call_operand.hbm [shape: f32[16,2048], index: 0, kind: input, shape index: {}]   ;;  %s4925_s1 = inlined_call_operand.hbm [shape: f32[8,2048], index: 1, kind: input, shape index: {}]   ;;  %s4926_s2 = inlined_call_operand.hbm [shape: f32[16,16], index: 2, kind: input, shape index: {}]   ;;  %s4927_s3 = inlined_call_operand.hbm [shape: f32[16,16], index: 3, kind: input, shape index: {}]   ;;  %s4928_s4 = inlined_call_operand.hbm [shape: f32[16,16], index: 4, kind: input, shape index: {}]   ;;  %s4929_s5 = inlined_call_operand.vmem [shape: f32[8,16], index: 5, kind: input, shape index: {}]   ;;  %s4930_s6 = inlined_call_operand.hbm [shape: f32[1,2048], index: 6, kind: output, shape index: {}]  }
   0x1   :  { %4976 = sst [smem:[#allocation104_spill]] %s4924_s0 }
   0x2   :  { %4977 = sst [smem:[#allocation105_spill]] %s4926_s2 }
   0x3   :  { %4978 = sst [smem:[#allocation106_spill]] %s4927_s3 }
   0x4   :  { %11 = vsyncpa [#allocation4], 0 }
   0x5   :  { %13 = vsyncpa [#allocation4 + $0x1], 0 }
   0x6   :  { %14 = vsyncpa [#allocation7], 0 }
   0x7   :  { %16 = vsyncpa [#allocation7 + $0x1], 0 }
   0x8   :  { %17 = vsyncpa [#allocation10], 0 }
   0x9   :  { %18 = vsyncpa [#allocation5], 0 }
   0xa   :  { %20 = vsyncpa [#allocation5 + $0x1], 0  ;;  %s3737_s21 = smov 0   ;;  %s3739_s22 = smov 0  }
   0xb   :  { %s3741_s23 = smov 0   ;;  %s3743_s24 = smov 0  }
   0xc LB: > { %s3758_s25 = sadd.s32 4294967295, %s3686_s24   ;;  %s3199_s26 = sadd.s32 4294967294, %s3686_s24   ;;  %s3686_s24 = sphi %s3743_s24, %s5190_s24   ;;  %s3682_s23 = sphi %s3741_s23, %s5194_s23   ;;  %s3678_s22 = sphi %s3739_s22, %s5193_s22   ;;  %s3674_s21 = sphi %s3737_s21, %s5192_s21  }
   0xd   : > { %s3762_s27 = sadd.s32 1, %s3686_s24   ;;  %s33_s28 = sadd.s32 1, %s3682_s23 }
   0xe   : > { %4979 = sst [smem:[#allocation18_spill]] %s3762_s27  ;;  %s30_s29 = ssub.s32 %s3686_s24, %s3762_s27 }
   0xf   : > { %p40_p0 = scmp.ne.s32.totalorder %s3682_s23, %s3678_s22  ;;  %p31_p1 = scmp.eq.s32.totalorder %s30_s29, 0 }
  0x10   : > { %p41_p2 = scmp.eq.s32.totalorder %s3686_s24, 0  ;;  %p46_p3 = scmp.ne.s32.totalorder %s3678_s22, %s3674_s21 }
  0x11   : > { %p4931_p4 = scmp.eq.s32.totalorder %s3758_s25, 0  ;;  %p180_p7 = scmp.eq.s32.totalorder %s3758_s25, 1 }
  0x12   : > { %s3774_s30 = scalar_select %p31_p1, %s3682_s23, %s33_s28  }
  0x13   : > { %p3776_p5 = por %p41_p2, %p40_p0  ;;  %p3782_p6 = por %p4931_p4, %p46_p3 }
  0x14   : > { %4980 = sst [smem:[#allocation19_spill]] %s3774_s30  ;;  %p186_p8 = scmp.eq.s32.totalorder %s3199_s26, 1 }
  0x15   : > { %s4981_s7 = scalar_select %p3776_p5, 1, 0 }
  0x16   : > { %s4982_s8 = scalar_select %p3782_p6, 1, 0 }
  0x17   : > { %p3200_p9 = scmp.ge.s32.totalorder %s3686_s24, 1  ;;  %p193_p10 = scmp.lt.s32.totalorder %s3686_s24, 3 }
  0x18   : > { %p3789_p11 = por %p180_p7, %p40_p0  ;;  %p3793_p12 = por %p186_p8, %p46_p3 }
  0x19   : > { %p3797_p13 = pnand %p3200_p9, %p193_p10  ;;  %s3688_s12 = smov [#allocation8]  }
  0x1a   : > { %s4983_s9 = scalar_select %p3789_p11, 1, 0 }
  0x1b   : > { %s4984_s10 = scalar_select %p3793_p12, 1, 0 }
  0x1c   : > { %s4985_s11 = scalar_select %p3797_p13, 1, 0 }
  0x1d   : > { %p3376_p1 = pneg %p3797_p13  ;;  %s205_s13 = sshll.u32 %s3688_s12, 4  ;;  %s206_s13 = int_to_ptr.vmem [resolvable:$true] %s205_s13 }
  0x1e   : > { %s3689_s15 = smov [#allocation9]   ;;  %s4987_s2 = sld [smem:[#allocation105_spill]] }
  0x1f   : > { %p3805_p2 = pnand %p3376_p1, %p4931_p4  ;;  %s218_s16 = sshll.u32 %s3689_s15, 4  ;;  %s219_s16 = int_to_ptr.vmem [resolvable:$true] %s218_s16 }
  0x21   : > { %p3819_p8 = pneg %p3805_p2 }
  0x24   : > { %s3464_s19 = scalar_lea.hbm %s4987_s2, 256 }
  0x25   : > { %p3465_p7 = scmp.ne.s32.totalorder %s4987_s2, %s3464_s19  ;;  %p3471_p1 = scmp.lt.u32.totalorder %s3464_s19, %s4987_s2 }
  0x27   : > { %p3467_p9 = pnand %p3819_p8, %p3465_p7 }
  0x29   : > { %p3468_p10 = pneg %p3467_p9 }
  0x2b   : > { %p3473_p0 = pnand %p3471_p1, %p3468_p10 }
  0x2d   : > { %3476 = shalt.err (!%p3473_p0)
}
  0x2e   : > { %s3477_s15 = scalar_lea.vmem %s206_s13, 256  ;;  %p3485_p11 = scmp.lt.s32.totalorder %s206_s13, %s206_s13 }
  0x2f   : > { %p3478_p4 = scmp.ne.s32.totalorder %s206_s13, %s3477_s15  ;;  %p3486_p6 = scmp.lt.s32.totalorder %s3477_s15, %s3477_s15 }
  0x31   : > { %p3480_p3 = pnand %p3478_p4, %p3819_p8  ;;  %p3487_p13 = por %p3486_p6, %p3485_p11 }
  0x33   : > { %p3481_p12 = pneg %p3480_p3 }
  0x35   : > { %p3488_p5 = pnand %p3487_p13, %p3481_p12 }
  0x37   : > { %3491 = shalt.err (!%p3488_p5)
}
  0x38   : > { %s3690_s17 = smov 128   ;;  %s3691_s18 = smov 8  }
  0x39   : > { %3379 = dma.hbm_to_vmem [thread:$0]  (!%p3805_p2), %s4987_s2, 256, %s206_s13, [#allocation7], %s3690_s17, %s3690_s17, %s3691_s18  }
  0x3a   : > { %p4989_p4 = scmp.ne.s32.totalorder %s4981_s7, 0  ;;  %p4990_p0 = scmp.lt.s32.totalorder %s3686_s24, 2 }
  0x3b   : > { %s4992_s3 = sld [smem:[#allocation106_spill]] }
  0x3c   : > { %p3842_p3 = pnand %p4990_p0, %p4989_p4 }
  0x3e   : > { %s4991_s26 = scalar_select %p3842_p3, 1, 0 }
  0x41   : > { %s3492_s15 = scalar_lea.hbm %s4992_s3, 256 }
  0x42   : > { %p3493_p5 = scmp.ne.s32.totalorder %s4992_s3, %s3492_s15  ;;  %p3499_p12 = scmp.lt.u32.totalorder %s3492_s15, %s4992_s3 }
  0x44   : > { %p3495_p6 = pnand %p3493_p5, %p3819_p8 }
  0x46   : > { %p3496_p11 = pneg %p3495_p6 }
  0x48   : > { %p3501_p13 = pnand %p3499_p12, %p3496_p11 }
  0x4a   : > { %3504 = shalt.err (!%p3501_p13)
}
  0x4b   : > { %s3505_s7 = scalar_lea.vmem %s219_s16, 256  ;;  %p3513_p1 = scmp.lt.s32.totalorder %s219_s16, %s219_s16 }
  0x4c   : > { %p3506_p7 = scmp.ne.s32.totalorder %s219_s16, %s3505_s7  ;;  %p3514_p4 = scmp.lt.s32.totalorder %s3505_s7, %s3505_s7 }
  0x4e   : > { %p3508_p9 = pnand %p3506_p7, %p3819_p8  ;;  %p3515_p0 = por %p3514_p4, %p3513_p1 }
  0x50   : > { %p3509_p10 = pneg %p3508_p9 }
  0x52   : > { %p3516_p3 = pnand %p3515_p0, %p3509_p10 }
  0x54   : > { %3519 = shalt.err (!%p3516_p3)
}
  0x55   : > { %3382 = dma.hbm_to_vmem [thread:$0]  (!%p3805_p2), %s4992_s3, 256, %s219_s16, [#allocation10], %s3690_s17, %s3690_s17, %s3691_s18  }
  0x56   : > { %s3692_s20 = smov [#allocation11]   ;;  %s3868_s12 = sand.u32 1, %s3682_s23  }
  0x57   : > { %s231_s29 = sshll.u32 %s3692_s20, 4  ;;  %s3520_s13 = scalar_lea.hbm %s4928_s4, 256  ;;  %s232_s29 = int_to_ptr.vmem [resolvable:$true] %s231_s29 }
  0x58   : > { %p3521_p3 = scmp.ne.s32.totalorder %s4928_s4, %s3520_s13  ;;  %p3527_p11 = scmp.lt.u32.totalorder %s3520_s13, %s4928_s4 }
  0x5a   : > { %p3523_p5 = pnand %p3521_p3, %p3819_p8 }
  0x5c   : > { %p3524_p6 = pneg %p3523_p5 }
  0x5e   : > { %p3529_p12 = pnand %p3527_p11, %p3524_p6 }
  0x60   : > { %3532 = shalt.err (!%p3529_p12)
}
  0x61   : > { %s3533_s16 = scalar_lea.vmem %s232_s29, 256  ;;  %p3541_p10 = scmp.lt.s32.totalorder %s232_s29, %s232_s29 }
  0x62   : > { %p3534_p13 = scmp.ne.s32.totalorder %s232_s29, %s3533_s16  ;;  %p3542_p1 = scmp.lt.s32.totalorder %s3533_s16, %s3533_s16 }
  0x64   : > { %p3536_p7 = pnand %p3534_p13, %p3819_p8  ;;  %p3543_p4 = por %p3542_p1, %p3541_p10 }
  0x66   : > { %p3537_p9 = pneg %p3536_p7 }
  0x68   : > { %p3544_p0 = pnand %p3543_p4, %p3537_p9 }
  0x6a   : > { %3547 = shalt.err (!%p3544_p0)
}
  0x6b   : > { %3385 = dma.hbm_to_vmem [thread:$0]  (!%p3805_p2), %s4928_s4, 256, %s232_s29, [#allocation10], %s3690_s17, %s3690_s17, %s3691_s18  }
  0x6c   : > { %s3205_s28 = sshll.u32 %s3868_s12, 7  ;;  %s3275_s15 = sshll.u32 %s3686_s24, 10 }
  0x6d   : > { %s4993_s0 = sld [smem:[#allocation104_spill]]  ;;  %s252_s7 = scalar_lea.vmem [#allocation3], %s3205_s28 }
  0x6e   : > { %s259_s27 = sshll.u32 %s252_s7, 4  ;;  %s269_s30 = sand.u32 1, %s3686_s24   ;;  %s3900_s27 = int_to_ptr.vmem [resolvable:$true] %s259_s27 }
  0x6f   : > { %s249_s16 = scalar_lea.sflag [#allocation4], %s3868_s12  ;;  %p4994_p8 = scmp.ne.s32.totalorder %s4991_s26, 0 }
  0x71   : > { %p3550_p3 = pneg %p4994_p8 }
  0x73   : > { %s3898_s14 = scalar_lea.hbm %s4993_s0, %s3275_s15  ;;  %s3553_s29 = scalar_lea.hbm %s4993_s0, 4096 }
  0x74   : > { %s3548_s2 = scalar_lea.hbm %s3898_s14, 2048  ;;  %p3554_p11 = scmp.lt.u32.totalorder %s3898_s14, %s4993_s0 }
  0x75   : > { %p3549_p2 = scmp.ne.s32.totalorder %s3898_s14, %s3548_s2  ;;  %p3555_p12 = scmp.lt.u32.totalorder %s3553_s29, %s3548_s2 }
  0x76   : > { %p3557_p7 = scmp.lt.u32.totalorder %s3548_s2, %s3898_s14 }
  0x77   : > { %p3551_p5 = pnand %p3550_p3, %p3549_p2  ;;  %p3556_p13 = por %p3555_p12, %p3554_p11 }
  0x79   : > { %p3552_p6 = pneg %p3551_p5  ;;  %p3558_p9 = por %p3557_p7, %p3556_p13 }
  0x7b   : > { %p3559_p10 = pnand %p3558_p9, %p3552_p6 }
  0x7d   : > { %3562 = shalt.err (!%p3559_p10)
}
  0x7e   : > { %s3563_s28 = scalar_lea.vmem %s3900_s27, 2048  ;;  %s3693_s13 = smov [#allocation3]  }
  0x7f   : > { %p3564_p1 = scmp.ne.s32.totalorder %s3900_s27, %s3563_s28  ;;  %s3568_s7 = sshll.u32 %s3693_s13, 4  ;;  %s3569_s7 = int_to_ptr.vmem [resolvable:$false] %s3568_s7 }
  0x80   : > { %s3570_s17 = scalar_lea.vmem %s3569_s7, 4096  ;;  %p3571_p2 = scmp.lt.s32.totalorder %s3900_s27, %s3569_s7 }
  0x81   : > { %p3566_p4 = pnand %p3564_p1, %p3550_p3  ;;  %p3572_p5 = scmp.lt.s32.totalorder %s3570_s17, %s3563_s28 }
  0x83   : > { %p3567_p0 = pneg %p3566_p4  ;;  %p3573_p11 = por %p3572_p5, %p3571_p2 }
  0x85   : > { %p3574_p12 = pnand %p3573_p11, %p3567_p0 }
  0x87   : > { %3577 = shalt.err (!%p3574_p12)
}
  0x88   : > { %s3694_s2 = smov 2048   ;;  %s3695_s18 = smov 1024  }
  0x89   : > { %s3696_s29 = smov 64   ;;  %s3208_s20 = sshll.u32 %s3868_s12, 6 }
  0x8a   : > { %3389 = dma.hbm_to_vmem [thread:$0]  (!%p4994_p8), %s3898_s14, 2048, %s3900_s27, %s249_s16, %s3694_s2, %s3695_s18, %s3696_s29  }
  0x8b   : > { %s3937_s13 = scalar_lea.hbm %s4925_s1, %s3275_s15  ;;  %s273_s7 = scalar_lea.vmem [#allocation6], %s3208_s20 }
  0x8c   : > { %s281_s17 = sshll.u32 %s273_s7, 4  ;;  %s270_s0 = scalar_lea.sflag [#allocation7], %s269_s30  ;;  %s282_s17 = int_to_ptr.vmem [resolvable:$true] %s281_s17 }
  0x8d   : > { %s3578_s3 = scalar_lea.hbm %s3937_s13, 1024  ;;  %s3583_s15 = scalar_lea.hbm %s4925_s1, 2048 }
  0x8e   : > { %p3579_p6 = scmp.ne.s32.totalorder %s3937_s13, %s3578_s3  ;;  %p3584_p9 = scmp.lt.u32.totalorder %s3937_s13, %s4925_s1 }
  0x8f   : > { %p3585_p10 = scmp.lt.u32.totalorder %s3583_s15, %s3578_s3  ;;  %p3587_p4 = scmp.lt.u32.totalorder %s3578_s3, %s3937_s13 }
  0x90   : > { %p3581_p13 = pnand %p3579_p6, %p3550_p3 }
  0x91   : > { %p3586_p1 = por %p3585_p10, %p3584_p9 }
  0x92   : > { %p3582_p7 = pneg %p3581_p13 }
  0x93   : > { %p3588_p0 = por %p3587_p4, %p3586_p1 }
  0x95   : > { %p3589_p2 = pnand %p3588_p0, %p3582_p7 }
  0x97   : > { %3592 = shalt.err (!%p3589_p2)
}
  0x98   : > { %s3593_s30 = scalar_lea.vmem %s282_s17, 1024  ;;  %s3697_s2 = smov [#allocation6]  }
  0x99   : > { %p3594_p5 = scmp.ne.s32.totalorder %s282_s17, %s3593_s30  ;;  %s3598_s18 = sshll.u32 %s3697_s2, 4  ;;  %s3599_s18 = int_to_ptr.vmem [resolvable:$false] %s3598_s18 }
  0x9a   : > { %s3600_s29 = scalar_lea.vmem %s3599_s18, 2048  ;;  %p3601_p6 = scmp.lt.s32.totalorder %s282_s17, %s3599_s18 }
  0x9b   : > { %p3596_p11 = pnand %p3594_p5, %p3550_p3  ;;  %p3602_p13 = scmp.lt.s32.totalorder %s3600_s29, %s3593_s30 }
  0x9d   : > { %p3597_p12 = pneg %p3596_p11  ;;  %p3603_p9 = por %p3602_p13, %p3601_p6 }
  0x9f   : > { %p3604_p10 = pnand %p3603_p9, %p3597_p12 }
  0xa1   : > { %3607 = shalt.err (!%p3604_p10)
}
  0xa2   : > { %3392 = dma.hbm_to_vmem [thread:$0]  (!%p4994_p8), %s3937_s13, 1024, %s282_s17, %s270_s0  }
  0xa3   : > { %p4995_p7 = scmp.ne.s32.totalorder %s4985_s11, 0 }
  0xa5   : > { %290 = sbr.rel (%p4995_p7) target bundleno = 1083 (0x43b), region = 44 }
  0xac   : > { %s3963_s3 = sand.u32 1, %s3678_s22   ;;  %p4996_p3 = scmp.ne.s32.totalorder %s4982_s8, 0 }
  0xad   : > { %s3212_s20 = sshll.u32 %s3963_s3, 7  ;;  %s293_s19 = scalar_lea.sflag [#allocation4], %s3963_s3 }
  0xae   : > { %s3967_s28 = scalar_lea.vmem [#allocation3], %s3212_s20 }
  0xaf   : > { %3653 = dma.done.wait (%p4996_p3), %s293_s19, 2048  }
  0xb0   : > { %3655 = vsyncadd (%p4996_p3), %s293_s19, 4294965248  ;;  %s301_s0 = sand.u32 1, %s3758_s25   ;;  %s3213_s11 = sshll.u32 %s3963_s3, 6 }
  0xb1   : > { %s302_s26 = scalar_lea.sflag [#allocation7], %s301_s0  ;;  %s305_s13 = scalar_lea.vmem [#allocation6], %s3213_s11 }
  0xb2   : > { %3657 = dma.done.wait (%p4996_p3), %s302_s26, 1024  }
  0xb3   : > { %3659 = vsyncadd (%p4996_p3), %s302_s26, 4294966272  ;;  %p4997_p8 = scmp.eq.s32.totalorder %s3758_s25, 0 }
  0xb5   : > { %3661 = dma.done.wait (%p4997_p8), [#allocation7], 256   ;;  %p4998_p1 = pmov %p4997_p8 }
  0xb7   : > { %3663 = vsyncadd (%p4998_p1), [#allocation7], 4294967040  ;;  %p4999_p4 = pmov %p4998_p1 }
  0xb8   : > { %p5000_p0 = pmov %p4998_p1 }
  0xb9   : > { %3665 = dma.done.wait (%p4999_p4), [#allocation10], 512  }
  0xba   : > { %3667 = vsyncadd (%p5000_p0), [#allocation10], 4294966784  ;;  %v3698_v0 = vmov 0.2820948   ;;  %v827_v1 = vlaneseq  ;;  %v3699_v2 = vmov 1966171168  }
  0xbb   : > { %810 = vst [vmem:[#allocation2] ss:$8 sm:$0xf] %v3698_v0  ;;  %811 = vst [vmem:[#allocation2] ss:$8 sm:$0xf0] %v3698_v0  ;;  %v825_v3 = vunpack.c.l.s4 %v3699_v2 }
  0xbc   : > { %v354_v4 = vld [vmem:[%s305_s13] sm:$0xff]  ;;  %v355_v5 = vld [vmem:[%s305_s13 + $0x8] sm:$0xff]  ;;  %v356_v6 = vld [vmem:[%s305_s13 + $0x10] sm:$0xff]  ;;  %v828_v7 = vshrl.u32 %v827_v1, 7  ;;  %vm1723_vm0 = vcmask 130048   ;;  %s3217_s17 = sshll.u32 %s3963_s3, 3 }
  0xbd   : > { %v357_v8 = vld [vmem:[%s305_s13 + $0x18] sm:$0xff]  ;;  %v358_v9 = vld [vmem:[%s305_s13 + $0x20] sm:$0xff]  ;;  %v359_v10 = vld [vmem:[%s305_s13 + $0x28] sm:$0xff]  ;;  %v362_v11 = vmul.f32 2.0, %v354_v4  ;;  %v363_v12 = vmul.f32 2.0, %v355_v5  ;;  %v364_v13 = vmul.f32 2.0, %v356_v6  ;;  %v826_v14 = vunpack.c.0.s8 %v825_v3 }
  0xbe   : > { %v360_v15 = vld [vmem:[%s305_s13 + $0x30] sm:$0xff]  ;;  %v361_v16 = vld [vmem:[%s305_s13 + $0x38] sm:$0xff]  ;;  %v365_v17 = vmul.f32 2.0, %v357_v8  ;;  %v366_v18 = vmul.f32 2.0, %v358_v9  ;;  %v367_v19 = vmul.f32 2.0, %v359_v10  ;;  %s3277_s12 = sshll.u32 %s3758_s25, 7 }
  0xbf   : > { %v368_v20 = vmul.f32 2.0, %v360_v15  ;;  %v369_v21 = vmul.f32 2.0, %v361_v16  ;;  %v3987_v22 = vadd.f32 -1.0, %v362_v11  ;;  %v3989_v23 = vadd.f32 -1.0, %v363_v12  ;;  %s350_s14 = scalar_lea.vmem [#allocation12], %s3217_s17  ;;  %s4880_s30 = scalar_lea.hbm %s4930_s6, %s3277_s12 }
  0xc0   : > { %v3991_v24 = vadd.f32 -1.0, %v364_v13  ;;  %v3993_v25 = vadd.f32 -1.0, %v365_v17  ;;  %v3995_v26 = vadd.f32 -1.0, %v366_v18  ;;  %v3997_v27 = vadd.f32 -1.0, %v367_v19  ;;  %s3078_s15 = sshll.u32 %s350_s14, 4  ;;  %s3064_s2 = scalar_lea.sflag [#allocation5], %s3963_s3  ;;  %s4882_s15 = int_to_ptr.vmem [resolvable:$true] %s3078_s15 }
  0xc1   : > { %v3999_v28 = vadd.f32 -1.0, %v368_v20  ;;  %v4001_v29 = vadd.f32 -1.0, %v369_v21  ;;  %v4005_v30 = vmul.f32 %v3987_v22, %v3987_v22  ;;  %v4007_v31 = vsub.s32 %v826_v14, %v828_v7  ;;  %s3608_s25 = scalar_lea.vmem %s4882_s15, 128  ;;  %p5187_p5 = scmp.ne.s32.totalorder %s4983_s9, 0 }
  0xc2   : > { %v4011_v32 = vmul.f32 %v3989_v23, %v3989_v23  ;;  %v4015_v33 = vmul.f32 %v3991_v24, %v3991_v24  ;;  %v4019_v34 = vmul.f32 %v3993_v25, %v3993_v25  ;;  %v4023_v35 = vmul.f32 %v3995_v26, %v3995_v26  ;;  %p3609_p2 = scmp.ne.s32.totalorder %s4882_s15, %s3608_s25  ;;  %s3701_s18 = smov [#allocation12]  }
  0xc3   : > { %v4027_v36 = vmul.f32 %v3997_v27, %v3997_v27  ;;  %v4031_v37 = vmul.f32 %v3999_v28, %v3999_v28  ;;  %v394_v38 = vrot.slane %v3987_v22, 1  ;;  %v395_v39 = vrot.slane %v3989_v23, 1  ;;  %s3612_s29 = sshll.u32 %s3701_s18, 4  ;;  %s3613_s29 = int_to_ptr.vmem [resolvable:$false] %s3612_s29 }
  0xc4   : > { %5001 = vst [vmem:[#allocation20_spill] sm:$0xff] %v4015_v33  ;;  %5002 = vst [vmem:[#allocation21_spill] sm:$0xff] %v4019_v34  ;;  %v396_v40 = vrot.slane %v3991_v24, 1  ;;  %v397_v41 = vrot.slane %v3993_v25, 1  ;;  %v398_v42 = vrot.slane %v3995_v26, 1  ;;  %v399_v43 = vrot.slane %v3997_v27, 1  ;;  %p3610_p11 = pnand %p3609_p2, %p5187_p5  ;;  %p3615_p6 = scmp.lt.s32.totalorder %s4882_s15, %s3613_s29 }
  0xc5   : > { %5003 = vst [vmem:[#allocation22_spill] sm:$0xff] %v4023_v35  ;;  %5004 = vst [vmem:[#allocation23_spill] sm:$0xff] %v4027_v36  ;;  %v4041_v44 = vmul.f32 %v4001_v29, %v4001_v29  ;;  %v400_v45 = vrot.slane %v3999_v28, 1  ;;  %v401_v46 = vrot.slane %v4001_v29, 1  ;;  %v4046_v47 = vmul.f32 %v3987_v22, %v394_v38  ;;  %s3614_s20 = scalar_lea.vmem %s3613_s29, 256 }
  0xc6   : > { %5005 = vst [vmem:[#allocation24_spill] sm:$0xff] %v4031_v37  ;;  %v4049_v48 = vmul.f32 %v3989_v23, %v395_v39  ;;  %v4052_v49 = vmul.f32 %v3991_v24, %v396_v40  ;;  %v4055_v50 = vmul.f32 %v3993_v25, %v397_v41  ;;  %v4058_v51 = vmul.f32 %v3995_v26, %v398_v42  ;;  %p3611_p12 = pneg %p3610_p11  ;;  %p3616_p13 = scmp.lt.s32.totalorder %s3614_s20, %s3608_s25 }
  0xc7   : > { %v4061_v52 = vmul.f32 %v3997_v27, %v399_v43  ;;  %v4064_v53 = vmul.f32 %v3999_v28, %v400_v45  ;;  %v4945_v54 = vrot.slane %v3987_v22, 2  ;;  %v4944_v55 = vrot.slane %v3989_v23, 2 }
  0xc8   : > { %v4943_v56 = vrot.slane %v3991_v24, 2  ;;  %v4942_v57 = vrot.slane %v3993_v25, 2  ;;  %v4941_v58 = vrot.slane %v3995_v26, 2  ;;  %v4940_v59 = vrot.slane %v3997_v27, 2  ;;  %p3617_p9 = por %p3616_p13, %p3615_p6 }
  0xc9   : > { %v4073_v60 = vmul.f32 %v4001_v29, %v401_v46  ;;  %v4939_v61 = vrot.slane %v3999_v28, 2  ;;  %v4938_v62 = vrot.slane %v4001_v29, 2  ;;  %v4080_v63 = vmul.f32 %v3987_v22, %v4945_v54 }
  0xca   : > { %v4085_v0 = vmul.f32 %v3989_v23, %v4944_v55  ;;  %v4090_v1 = vmul.f32 %v3991_v24, %v4943_v56  ;;  %v4095_v2 = vmul.f32 %v3993_v25, %v4942_v57  ;;  %v4100_v3 = vmul.f32 %v3995_v26, %v4941_v58  ;;  %p3618_p10 = pnand %p3617_p9, %p3611_p12 }
  0xcb   : > { %v4105_v4 = vmul.f32 %v3997_v27, %v4940_v59  ;;  %v4110_v5 = vmul.f32 %v3999_v28, %v4939_v61  ;;  %v442_v6 = vmul.f32 -0.48860252, %v3987_v22  ;;  %v443_v7 = vmul.f32 -0.48860252, %v3989_v23 }
  0xcc   : > { %v4117_v8 = vmul.f32 %v4001_v29, %v4938_v62  ;;  %v444_v9 = vmul.f32 -0.48860252, %v3991_v24  ;;  %v445_v10 = vmul.f32 -0.48860252, %v3993_v25  ;;  %v446_v11 = vmul.f32 -0.48860252, %v3995_v26 }
  0xcd   : > { %v447_v12 = vmul.f32 -0.48860252, %v3997_v27  ;;  %v448_v13 = vmul.f32 -0.48860252, %v3999_v28  ;;  %v449_v14 = vmul.f32 -0.48860252, %v4001_v29  ;;  %v820_v15 = vcombine.low %v442_v6, %v443_v7 }
  0xce   : > { %v4126_v16 = vmul.f32 0.48860252, %v3987_v22  ;;  %v4129_v17 = vmul.f32 0.48860252, %v3989_v23  ;;  %v4132_v18 = vmul.f32 0.48860252, %v3991_v24  ;;  %v821_v19 = vcombine.low %v444_v9, %v445_v10 }
  0xcf   : > { %v4135_v20 = vmul.f32 0.48860252, %v3993_v25  ;;  %v4138_v21 = vmul.f32 0.48860252, %v3995_v26  ;;  %v4141_v38 = vmul.f32 0.48860252, %v3997_v27  ;;  %v822_v39 = vcombine.low %v446_v11, %v447_v12 }
  0xd0   : > { %v4144_v40 = vmul.f32 0.48860252, %v3999_v28  ;;  %v4147_v41 = vmul.f32 0.48860252, %v4001_v29  ;;  %v4150_v42 = vmul.f32 1.0925485, %v4046_v47  ;;  %v823_v43 = vcombine.low %v448_v13, %v449_v14 }
  0xd1   : > { %v4153_v45 = vmul.f32 1.0925485, %v4049_v48  ;;  %v4156_v46 = vmul.f32 1.0925485, %v4052_v49  ;;  %v4159_v6 = vmul.f32 1.0925485, %v4055_v50  ;;  %v4162_v7 = vrot.slane %v820_v15, %v4007_v31 }
  0xd2   : > { %5006 = vst [vmem:[#allocation25_spill] sm:$0xff] %v4150_v42  ;;  %v4165_v9 = vmul.f32 1.0925485, %v4058_v51  ;;  %v4168_v10 = vmul.f32 1.0925485, %v4061_v52  ;;  %v4174_v12 = vrot.slane %v821_v19, %v4007_v31  ;;  %v4186_v62 = vrot.slane %v822_v39, %v4007_v31 }
  0xd3   : > { %5007 = vst [vmem:[#allocation26_spill] sm:$0xff] %v4153_v45  ;;  %5008 = vst [vmem:[#allocation27_spill] sm:$0xff] %v4156_v46  ;;  %v4171_v11 = vmul.f32 1.0925485, %v4064_v53  ;;  %v4177_v13 = vmul.f32 1.0925485, %v4073_v60  ;;  %v4198_v58 = vrot.slane %v823_v43, %v4007_v31 }
  0xd4   : > { %5009 = vst [vmem:[#allocation28_spill] sm:$0xff] %v4159_v6  ;;  %5010 = vst [vmem:[#allocation29_spill] sm:$0xff] %v4162_v7  ;;  %v4180_v14 = vmul.f32 -1.0925485, %v4046_v47  ;;  %v4183_v15 = vmul.f32 -1.0925485, %v4049_v48  ;;  %v852_v55 = vcombine.high %v4162_v7, %v4174_v12  ;;  %v881_v6 = vcombine.low %v4126_v16, %v4129_v17 }
  0xd5   : > { %5011 = vst [vmem:[#allocation30_spill] sm:$0xff] %v4165_v9  ;;  %5012 = vst [vmem:[#allocation31_spill] sm:$0xff] %v4168_v10  ;;  %v4189_v61 = vmul.f32 -1.0925485, %v4052_v49  ;;  %v4192_v59 = vmul.f32 -1.0925485, %v4055_v50  ;;  %v853_v43 = vcombine.high %v4186_v62, %v4198_v58 }
  0xd6   : > { %5013 = vst [vmem:[#allocation32_spill] sm:$0xff] %v4171_v11  ;;  %5014 = vst [vmem:[#allocation33_spill] sm:$0xff] %v4174_v12  ;;  %v4195_v19 = vmul.f32 -1.0925485, %v4058_v51  ;;  %v4201_v57 = vmul.f32 -1.0925485, %v4061_v52 }
  0xd7   : > { %5015 = vst [vmem:[#allocation34_spill] sm:$0xff] %v4177_v13  ;;  %5016 = vst [vmem:[#allocation35_spill] sm:$0xff] %v4180_v14  ;;  %v4204_v56 = vmul.f32 -1.0925485, %v4064_v53  ;;  %v4207_v39 = vmul.f32 -1.0925485, %v4073_v60  ;;  %v867_v13 = vrot.slane %v853_v43, %v4007_v31 }
  0xd8   : > { %5017 = vst [vmem:[#allocation36_spill] sm:$0xff] %v4183_v15  ;;  %5018 = vst [vmem:[#allocation37_spill] sm:$0xff] %v4186_v62  ;;  %v474_v54 = vmul.f32 0.9461747, %v4005_v30  ;;  %v480_v14 = vmul.f32 0.9461747, %v4031_v37 }
  0xd9   : > { %5019 = vst [vmem:[#allocation38_spill] sm:$0xff] %v4189_v61  ;;  %5020 = vst [vmem:[#allocation39_spill] sm:$0xff] %v4192_v59  ;;  %v475_v61 = vmul.f32 0.9461747, %v4011_v32  ;;  %v478_v59 = vmul.f32 0.9461747, %v4023_v35 }
  0xda   : > { %5021 = vst [vmem:[#allocation40_spill] sm:$0xff] %v4195_v19  ;;  %5022 = vst [vmem:[#allocation41_spill] sm:$0xff] %v4198_v58  ;;  %v476_v19 = vmul.f32 0.9461747, %v4015_v33  ;;  %v481_v15 = vmul.f32 0.9461747, %v4041_v44 }
  0xdb   : > { %5023 = vst [vmem:[#allocation42_spill] sm:$0xff] %v4201_v57  ;;  %5024 = vst [vmem:[#allocation43_spill] sm:$0xff] %v4204_v56  ;;  %v477_v57 = vmul.f32 0.9461747, %v4019_v34  ;;  %v479_v56 = vmul.f32 0.9461747, %v4027_v36 }
  0xdc   : > { %5025 = vst [vmem:[#allocation44_spill] sm:$0xff] %v4207_v39  ;;  %v860_v39 = vrot.slane %v852_v55, %v4007_v31  ;;  %v4222_v11 = vadd.f32 -0.31539157, %v474_v54  ;;  %v4225_v9 = vadd.f32 -0.31539157, %v475_v61 }
  0xdd   : > { %v4227_v10 = vadd.f32 -0.31539157, %v476_v19  ;;  %v4229_v46 = vadd.f32 -0.31539157, %v477_v57  ;;  %v4233_v42 = vadd.f32 -0.31539157, %v478_v59  ;;  %v882_v57 = vcombine.low %v4132_v18, %v4135_v20 }
  0xde   : > { %5026 = vst [vmem:[#allocation45_spill] sm:$0xff] %v4222_v11  ;;  %5027 = vst [vmem:[#allocation46_spill] sm:$0xff] %v4225_v9  ;;  %v4235_v55 = vadd.f32 -0.31539157, %v479_v56  ;;  %v4237_v45 = vadd.f32 -0.31539157, %v480_v14  ;;  %v868_v62 = vcombine.low %v860_v39, %v867_v13 }
  0xdf   : > { %5028 = vst [vmem:[#allocation47_spill] sm:$0xff] %v4227_v10  ;;  %5029 = vst [vmem:[#allocation48_spill] sm:$0xff] %v4229_v46  ;;  %v4239_v54 = vadd.f32 -0.31539157, %v481_v15  ;;  %v4242_v43 = vmul.f32 -1.0925485, %v4080_v63  ;;  %v883_v63 = vcombine.low %v4138_v21, %v4141_v38 }
  0xe0   : > { %5030 = vst [vmem:[#allocation49_spill] sm:$0xff] %v4233_v42  ;;  %5031 = vst [vmem:[#allocation50_spill] sm:$0xff] %v4235_v55  ;;  %v4245_v61 = vmul.f32 -1.0925485, %v4085_v0  ;;  %v4250_v16 = vmul.f32 -1.0925485, %v4090_v1 }
  0xe1   : > { %5032 = vst [vmem:[#allocation51_spill] sm:$0xff] %v4237_v45  ;;  %5033 = vst [vmem:[#allocation52_spill] sm:$0xff] %v4239_v54  ;;  %v4253_v56 = vmul.f32 -1.0925485, %v4095_v2  ;;  %v4256_v59 = vmul.f32 -1.0925485, %v4100_v3  ;;  %v884_v2 = vcombine.low %v4144_v40, %v4147_v41 }
  0xe2   : > { %5034 = vst [vmem:[#allocation53_spill] sm:$0xff] %v4242_v43  ;;  %5035 = vst [vmem:[#allocation54_spill] sm:$0xff] %v4245_v61  ;;  %v4261_v0 = vmul.f32 -1.0925485, %v4105_v4  ;;  %v4264_v17 = vmul.f32 -1.0925485, %v4110_v5 }
  0xe3   : > { %5036 = vst [vmem:[#allocation55_spill] sm:$0xff] %v4250_v16  ;;  %5037 = vst [vmem:[#allocation56_spill] sm:$0xff] %v4253_v56  ;;  %v4267_v1 = vmul.f32 -1.0925485, %v4117_v8  ;;  %v506_v3 = vrot.slane %v4005_v30, 1  ;;  %v507_v18 = vrot.slane %v4011_v32, 1 }
  0xe4   : > { %5038 = vst [vmem:[#allocation57_spill] sm:$0xff] %v4256_v59  ;;  %871 = vst [vmem:[#allocation2 + $0x1] ss:$8 sm:$0xf] %v868_v62  ;;  %v508_v20 = vrot.slane %v4015_v33, 1  ;;  %v510_v4 = vrot.slane %v4023_v35, 1 }
  0xe5   : > { %872 = vst [vmem:[#allocation2 + $0x1] ss:$8 sm:$0xf0] %v868_v62  ;;  %5039 = vst [vmem:[#allocation58_spill] sm:$0xff] %v4261_v0  ;;  %v509_v62 = vrot.slane %v4019_v34, 1  ;;  %v511_v21 = vrot.slane %v4027_v36, 1  ;;  %v4280_v38 = vsub.f32 %v4005_v30, %v506_v3  ;;  %v4283_v40 = vsub.f32 %v4011_v32, %v507_v18 }
  0xe6   : > { %5040 = vst [vmem:[#allocation59_spill] sm:$0xff] %v4264_v17  ;;  %5041 = vst [vmem:[#allocation60_spill] sm:$0xff] %v4267_v1  ;;  %v512_v5 = vrot.slane %v4031_v37, 1  ;;  %v513_v8 = vrot.slane %v4041_v44, 1  ;;  %v4286_v41 = vsub.f32 %v4015_v33, %v508_v20  ;;  %v4292_v14 = vsub.f32 %v4023_v35, %v510_v4 }
  0xe7   : > { %5042 = vst [vmem:[#allocation61_spill] sm:$0xff] %v4280_v38  ;;  %5043 = vst [vmem:[#allocation62_spill] sm:$0xff] %v4283_v40  ;;  %v4289_v13 = vsub.f32 %v4019_v34, %v509_v62  ;;  %v4295_v15 = vsub.f32 %v4027_v36, %v511_v21  ;;  %v4304_v17 = vmul.f32 0.54627424, %v4280_v38  ;;  %v4307_v1 = vmul.f32 0.54627424, %v4283_v40 }
  0xe8   : > { %5044 = vst [vmem:[#allocation63_spill] sm:$0xff] %v4286_v41  ;;  %5046 = vst [vmem:[#allocation65_spill] sm:$0xff] %v4292_v14  ;;  %v4298_v19 = vsub.f32 %v4031_v37, %v512_v5  ;;  %v4301_v39 = vsub.f32 %v4041_v44, %v513_v8  ;;  %v4310_v59 = vmul.f32 0.54627424, %v4286_v41  ;;  %v4313_v0 = vrot.slane %v881_v6, %v4007_v31 }
  0xe9   : > { %5045 = vst [vmem:[#allocation64_spill] sm:$0xff] %v4289_v13  ;;  %5047 = vst [vmem:[#allocation66_spill] sm:$0xff] %v4295_v15  ;;  %v4316_v16 = vmul.f32 0.54627424, %v4289_v13  ;;  %v4319_v56 = vmul.f32 0.54627424, %v4292_v14 }
  0xea   : > { %5048 = vst [vmem:[#allocation67_spill] sm:$0xff] %v4298_v19  ;;  %5049 = vst [vmem:[#allocation68_spill] sm:$0xff] %v4301_v39  ;;  %v4322_v43 = vmul.f32 0.54627424, %v4295_v15  ;;  %v4334_v6 = vmul.f32 0.5900436, %v3987_v22 }
  0xeb   : > { %5050 = vst [vmem:[#allocation69_spill] sm:$0xff] %v4304_v17  ;;  %5051 = vst [vmem:[#allocation70_spill] sm:$0xff] %v4307_v1  ;;  %v4325_v17 = vrot.slane %v882_v57, %v4007_v31  ;;  %v4328_v1 = vmul.f32 0.54627424, %v4298_v19  ;;  %v4346_v57 = vmul.f32 0.5900436, %v3993_v25 }
  0xec   : > { %5052 = vst [vmem:[#allocation71_spill] sm:$0xff] %v4310_v59  ;;  %5053 = vst [vmem:[#allocation72_spill] sm:$0xff] %v4316_v16  ;;  %v4331_v59 = vmul.f32 0.54627424, %v4301_v39  ;;  %v4337_v16 = vrot.slane %v883_v63, %v4007_v31  ;;  %v4355_v61 = vmul.f32 0.5900436, %v3997_v27 }
  0xed   : > { %5054 = vst [vmem:[#allocation73_spill] sm:$0xff] %v4319_v56  ;;  %5055 = vst [vmem:[#allocation74_spill] sm:$0xff] %v4322_v43  ;;  %v4340_v56 = vmul.f32 0.5900436, %v3989_v23  ;;  %v4343_v43 = vmul.f32 0.5900436, %v3991_v24  ;;  %v913_v45 = vcombine.low %v4313_v0, %v4325_v17 }
  0xee   : > { %5056 = vst [vmem:[#allocation75_spill] sm:$0xff] %v4328_v1  ;;  %5057 = vst [vmem:[#allocation76_spill] sm:$0xff] %v4331_v59  ;;  %v4349_v1 = vrot.slane %v884_v2, %v4007_v31  ;;  %v4352_v59 = vmul.f32 0.5900436, %v3995_v26  ;;  %v4358_v63 = vmul.f32 0.5900436, %v3999_v28 }
  0xef   : > { %5058 = vst [vmem:[#allocation77_spill] sm:$0xff] %v4334_v6  ;;  %5059 = vst [vmem:[#allocation78_spill] sm:$0xff] %v4340_v56  ;;  %v4363_v54 = vmul.f32 0.5900436, %v4001_v29  ;;  %v546_v42 = vmul.f32 -3.0, %v4005_v30  ;;  %v547_v2 = vmul.f32 -3.0, %v4011_v32 }
  0xf0   : > { %5060 = vst [vmem:[#allocation79_spill] sm:$0xff] %v4343_v43  ;;  %5061 = vst [vmem:[#allocation80_spill] sm:$0xff] %v4346_v57  ;;  %v548_v55 = vmul.f32 -3.0, %v4015_v33  ;;  %v549_v10 = vmul.f32 -3.0, %v4019_v34  ;;  %v550_v46 = vmul.f32 -3.0, %v4023_v35  ;;  %v551_v11 = vmul.f32 -3.0, %v4027_v36 }
  0xf1   : > { %5062 = vst [vmem:[#allocation81_spill] sm:$0xff] %v4352_v59  ;;  %5063 = vst [vmem:[#allocation82_spill] sm:$0xff] %v4355_v61  ;;  %v552_v9 = vmul.f32 -3.0, %v4031_v37  ;;  %v553_v39 = vmul.f32 -3.0, %v4041_v44  ;;  %v554_v0 = vadd.f32 %v546_v42, %v506_v3  ;;  %v555_v17 = vadd.f32 %v547_v2, %v507_v18 }
  0xf2   : > { %5064 = vst [vmem:[#allocation83_spill] sm:$0xff] %v4358_v63  ;;  %5065 = vst [vmem:[#allocation84_spill] sm:$0xff] %v4363_v54  ;;  %v556_v19 = vadd.f32 %v548_v55, %v508_v20  ;;  %v557_v15 = vadd.f32 %v549_v10, %v509_v62  ;;  %v558_v14 = vadd.f32 %v550_v46, %v510_v4  ;;  %v596_v18 = vmul.f32 2.8906114, %v4052_v49 }
  0xf3   : > { %v559_v13 = vadd.f32 %v551_v11, %v511_v21  ;;  %v560_v41 = vadd.f32 %v552_v9, %v512_v5  ;;  %v561_v40 = vadd.f32 %v553_v39, %v513_v8  ;;  %v570_v38 = vrot.slane %v554_v0, 7 }
  0xf4   : > { %v571_v58 = vrot.slane %v555_v17, 7  ;;  %v572_v7 = vrot.slane %v556_v19, 7  ;;  %v573_v12 = vrot.slane %v557_v15, 7  ;;  %v574_v34 = vrot.slane %v558_v14, 7 }
  0xf5   : > { %v575_v35 = vrot.slane %v559_v13, 7  ;;  %v576_v33 = vrot.slane %v560_v41, 7  ;;  %v577_v36 = vrot.slane %v561_v40, 7  ;;  %v4374_v37 = vmul.f32 %v570_v38, %v4334_v6 }
  0xf6   : > { %v4377_v42 = vmul.f32 %v571_v58, %v4340_v56  ;;  %v4380_v10 = vmul.f32 %v572_v7, %v4343_v43  ;;  %v4383_v46 = vmul.f32 %v573_v12, %v4346_v57  ;;  %v4386_v9 = vmul.f32 %v574_v34, %v4352_v59 }
  0xf7   : > { %5066 = vst [vmem:[#allocation85_spill] sm:$0xff] %v4374_v37  ;;  %v4389_v11 = vmul.f32 %v575_v35, %v4355_v61  ;;  %v4392_v55 = vmul.f32 %v576_v33, %v4358_v63  ;;  %v4395_v3 = vmul.f32 %v577_v36, %v4363_v54  ;;  %v594_v58 = vmul.f32 2.8906114, %v4046_v47 }
  0xf8   : > { %5067 = vst [vmem:[#allocation86_spill] sm:$0xff] %v4377_v42  ;;  %5068 = vst [vmem:[#allocation87_spill] sm:$0xff] %v4380_v10  ;;  %v595_v7 = vmul.f32 2.8906114, %v4049_v48  ;;  %v597_v12 = vmul.f32 2.8906114, %v4055_v50  ;;  %v914_v35 = vcombine.low %v4337_v16, %v4349_v1  ;;  %v921_v19 = vrot.slane %v913_v45, %v4007_v31 }
  0xf9   : > { %5069 = vst [vmem:[#allocation88_spill] sm:$0xff] %v4383_v46  ;;  %5070 = vst [vmem:[#allocation89_spill] sm:$0xff] %v4386_v9  ;;  %v598_v34 = vmul.f32 2.8906114, %v4058_v51  ;;  %v599_v20 = vmul.f32 2.8906114, %v4061_v52 }
  0xfa   : > { %5071 = vst [vmem:[#allocation90_spill] sm:$0xff] %v4389_v11  ;;  %5072 = vst [vmem:[#allocation91_spill] sm:$0xff] %v4392_v55  ;;  %v600_v33 = vmul.f32 2.8906114, %v4064_v53  ;;  %v601_v36 = vmul.f32 2.8906114, %v4073_v60  ;;  %v928_v17 = vrot.slane %v914_v35, %v4007_v31 }
  0xfb   : > { %5073 = vst [vmem:[#allocation92_spill] sm:$0xff] %v4395_v3  ;;  %v5074_v62 = vrot.slane %v3987_v22, 2  ;;  %v5076_v48 = vrot.slane %v3989_v23, 2  ;;  %v5078_v50 = vrot.slane %v3991_v24, 2  ;;  %v5080_v52 = vrot.slane %v3993_v25, 2  ;;  %v5092_v45 = vld [vmem:[#allocation22_spill] sm:$0xff] }
  0xfc   : > { %v5082_v53 = vrot.slane %v3995_v26, 2  ;;  %v5084_v60 = vrot.slane %v3997_v27, 2  ;;  %v5086_v21 = vrot.slane %v3999_v28, 2  ;;  %v5088_v8 = vrot.slane %v4001_v29, 2 }
  0xfd   : > { %v4409_v47 = vmul.f32 %v594_v58, %v5074_v62  ;;  %v4413_v49 = vmul.f32 %v595_v7, %v5076_v48  ;;  %v4417_v51 = vmul.f32 %v596_v18, %v5078_v50  ;;  %v4421_v4 = vmul.f32 %v597_v12, %v5080_v52  ;;  %v5090_v18 = vld [vmem:[#allocation20_spill] sm:$0xff] }
  0xfe   : > { %v4425_v16 = vmul.f32 %v598_v34, %v5082_v53  ;;  %v4429_v1 = vmul.f32 %v599_v20, %v5084_v60  ;;  %v4433_v5 = vmul.f32 %v600_v33, %v5086_v21  ;;  %v4437_v38 = vmul.f32 %v601_v36, %v5088_v8  ;;  %v5091_v34 = vld [vmem:[#allocation21_spill] sm:$0xff]  ;;  %v5093_v36 = vld [vmem:[#allocation23_spill] sm:$0xff]  ;;  %v5094_v48 = vld [vmem:[#allocation24_spill] sm:$0xff] }
  0xff   : > { %5075 = vst [vmem:[#allocation93_spill] sm:$0xff] %v4409_v47  ;;  %5077 = vst [vmem:[#allocation94_spill] sm:$0xff] %v4413_v49  ;;  %v4440_v40 = vmul.f32 0.4570458, %v3987_v22  ;;  %v4443_v41 = vmul.f32 0.4570458, %v3989_v23 }
 0x100   : > { %5079 = vst [vmem:[#allocation95_spill] sm:$0xff] %v4417_v51  ;;  %5081 = vst [vmem:[#allocation96_spill] sm:$0xff] %v4421_v4  ;;  %v4446_v13 = vmul.f32 0.4570458, %v3991_v24  ;;  %v4449_v14 = vmul.f32 0.4570458, %v3993_v25 }
 0x101   : > { %5083 = vst [vmem:[#allocation97_spill] sm:$0xff] %v4425_v16  ;;  %5085 = vst [vmem:[#allocation98_spill] sm:$0xff] %v4429_v1  ;;  %v4452_v15 = vmul.f32 0.4570458, %v3995_v26  ;;  %v4456_v39 = vmul.f32 0.4570458, %v3997_v27 }
 0x102   : > { %5087 = vst [vmem:[#allocation99_spill] sm:$0xff] %v4433_v5  ;;  %5089 = vst [vmem:[#allocation100_spill] sm:$0xff] %v4437_v38  ;;  %v4459_v2 = vmul.f32 0.4570458, %v3999_v28  ;;  %v4462_v0 = vmul.f32 0.4570458, %v4001_v29 }
 0x103   : > { %v618_v58 = vmul.f32 5.0, %v4005_v30  ;;  %v619_v7 = vmul.f32 5.0, %v4011_v32  ;;  %v620_v12 = vmul.f32 5.0, %v5090_v18  ;;  %v621_v20 = vmul.f32 5.0, %v5091_v34 }
 0x104   : > { %v622_v33 = vmul.f32 5.0, %v5092_v45  ;;  %v623_v62 = vmul.f32 5.0, %v5093_v36  ;;  %v624_v50 = vmul.f32 5.0, %v5094_v48  ;;  %v625_v52 = vmul.f32 5.0, %v4041_v44 }
 0x105   : > { %v626_v53 = vsub.f32 1.0, %v618_v58  ;;  %v627_v60 = vsub.f32 1.0, %v619_v7  ;;  %v628_v21 = vsub.f32 1.0, %v620_v12  ;;  %v629_v35 = vsub.f32 1.0, %v621_v20 }
 0x106   : > { %v630_v8 = vsub.f32 1.0, %v622_v33  ;;  %v631_v5 = vsub.f32 1.0, %v623_v62  ;;  %v632_v38 = vsub.f32 1.0, %v624_v50  ;;  %v633_v16 = vsub.f32 1.0, %v625_v52 }
 0x107   : > { %v642_v1 = vrot.slane %v626_v53, 1  ;;  %v643_v51 = vrot.slane %v627_v60, 1  ;;  %v644_v4 = vrot.slane %v628_v21, 1  ;;  %v645_v47 = vrot.slane %v629_v35, 1 }
 0x108   : > { %v646_v49 = vrot.slane %v630_v8, 1  ;;  %v647_v55 = vrot.slane %v631_v5, 1  ;;  %v648_v3 = vrot.slane %v632_v38, 1  ;;  %v649_v9 = vrot.slane %v633_v16, 1 }
 0x109   : > { %v4474_v11 = vmul.f32 %v642_v1, %v4440_v40  ;;  %v4477_v10 = vmul.f32 %v643_v51, %v4443_v41  ;;  %v4480_v46 = vmul.f32 %v644_v4, %v4446_v13  ;;  %v4483_v37 = vmul.f32 %v645_v47, %v4449_v14 }
 0x10a   : > { %v4486_v42 = vmul.f32 %v646_v49, %v4452_v15  ;;  %v4489_v54 = vmul.f32 %v647_v55, %v4456_v39  ;;  %v4492_v63 = vmul.f32 %v648_v3, %v4459_v2  ;;  %v4495_v1 = vmul.f32 %v649_v9, %v4462_v0 }
 0x10b   : > { %5095 = vst [vmem:[#allocation20_spill] sm:$0xff] %v4474_v11  ;;  %5096 = vst [vmem:[#allocation21_spill] sm:$0xff] %v4477_v10  ;;  %v666_v51 = vmul.f32 0.37317634, %v3987_v22  ;;  %v667_v4 = vmul.f32 0.37317634, %v3989_v23  ;;  %v929_v47 = vcombine.high %v921_v19, %v928_v17 }
 0x10c   : > { %5097 = vst [vmem:[#allocation22_spill] sm:$0xff] %v4480_v46  ;;  %5098 = vst [vmem:[#allocation23_spill] sm:$0xff] %v4483_v37  ;;  %v668_v46 = vmul.f32 0.37317634, %v3991_v24  ;;  %v669_v37 = vmul.f32 0.37317634, %v3993_v25 }
 0x10d   : > { %5099 = vst [vmem:[#allocation24_spill] sm:$0xff] %v4486_v42  ;;  %5100 = vst [vmem:[#allocation101_spill] sm:$0xff] %v4489_v54  ;;  %v670_v49 = vmul.f32 0.37317634, %v3995_v26  ;;  %v671_v55 = vmul.f32 0.37317634, %v3997_v27 }
 0x10e   : > { %5101 = vst [vmem:[#allocation102_spill] sm:$0xff] %v4492_v63  ;;  %5102 = vst [vmem:[#allocation103_spill] sm:$0xff] %v4495_v1  ;;  %v5103_v42 = vld [vmem:[#allocation33_spill] sm:$0xff]  ;;  %v672_v63 = vmul.f32 0.37317634, %v3999_v28  ;;  %v3234_v1 = vadd.f32 -3.0, %v618_v58 }
 0x10f   : > { %v5104_v54 = vld [vmem:[#allocation29_spill] sm:$0xff]  ;;  %v673_v9 = vmul.f32 0.37317634, %v4001_v29  ;;  %v3235_v11 = vadd.f32 -3.0, %v619_v7  ;;  %v3236_v10 = vadd.f32 -3.0, %v620_v12  ;;  %v3237_v61 = vadd.f32 -3.0, %v621_v20 }
 0x110   : > { %v934_v3 = vcombine.low %v5104_v54, %v5103_v42  ;;  %932 = vst [vmem:[#allocation2 + $0x2] ss:$8 sm:$0xf] %v929_v47  ;;  %933 = vst [vmem:[#allocation2 + $0x2] ss:$8 sm:$0xf0] %v929_v47  ;;  %v4507_v43 = vmul.f32 %v3234_v1, %v666_v51 }
 0x111   : > { %v3238_v19 = vadd.f32 -3.0, %v622_v33  ;;  %v3239_v17 = vadd.f32 -3.0, %v623_v62  ;;  %v3240_v59 = vadd.f32 -3.0, %v624_v50  ;;  %v3241_v57 = vadd.f32 -3.0, %v625_v52 }
 0x112   : > { %v4509_v56 = vmul.f32 %v3235_v11, %v667_v4  ;;  %v4511_v6 = vmul.f32 %v3236_v10, %v668_v46  ;;  %v4513_v54 = vmul.f32 %v3237_v61, %v669_v37  ;;  %v690_v20 = vrot.slane %v626_v53, 2  ;;  %v5111_v4 = vld [vmem:[#allocation65_spill] sm:$0xff] }
 0x113   : > { %v4515_v42 = vmul.f32 %v3238_v19, %v670_v49  ;;  %v4517_v58 = vmul.f32 %v3239_v17, %v671_v55  ;;  %v4519_v7 = vmul.f32 %v3240_v59, %v672_v63  ;;  %v4521_v12 = vmul.f32 %v3241_v57, %v673_v9  ;;  %v5112_v49 = vld [vmem:[#allocation66_spill] sm:$0xff] }
 0x114   : > { %v691_v33 = vrot.slane %v627_v60, 2  ;;  %v692_v62 = vrot.slane %v628_v21, 2  ;;  %v693_v50 = vrot.slane %v629_v35, 2  ;;  %v694_v52 = vrot.slane %v630_v8, 2  ;;  %v5108_v21 = vld [vmem:[#allocation62_spill] sm:$0xff]  ;;  %v5109_v35 = vld [vmem:[#allocation63_spill] sm:$0xff] }
 0x115   : > { %v695_v1 = vrot.slane %v631_v5, 2  ;;  %v696_v11 = vrot.slane %v632_v38, 2  ;;  %v697_v51 = vrot.slane %v633_v16, 2  ;;  %v4524_v10 = vmul.f32 %v690_v20, %v4440_v40  ;;  %v5110_v8 = vld [vmem:[#allocation64_spill] sm:$0xff] }
 0x116   : > { %v4527_v37 = vmul.f32 %v691_v33, %v4443_v41  ;;  %v4530_v61 = vmul.f32 %v692_v62, %v4446_v13  ;;  %v4533_v59 = vmul.f32 %v693_v50, %v4449_v14  ;;  %v4536_v57 = vmul.f32 %v694_v52, %v4452_v15  ;;  %v5105_v14 = vld [vmem:[#allocation41_spill] sm:$0xff] }
 0x117   : > { %v4539_v63 = vmul.f32 %v695_v1, %v4456_v39  ;;  %v4542_v46 = vmul.f32 %v696_v11, %v4459_v2  ;;  %v4545_v16 = vmul.f32 %v697_v51, %v4462_v0  ;;  %v714_v5 = vmul.f32 1.4453057, %v3987_v22  ;;  %v5106_v15 = vld [vmem:[#allocation37_spill] sm:$0xff] }
 0x118   : > { %v715_v38 = vmul.f32 1.4453057, %v3989_v23  ;;  %v716_v40 = vmul.f32 1.4453057, %v3991_v24  ;;  %v717_v41 = vmul.f32 1.4453057, %v3993_v25  ;;  %v935_v39 = vcombine.low %v5106_v15, %v5105_v14 }
 0x119   : > { %v718_v13 = vmul.f32 1.4453057, %v3995_v26  ;;  %v719_v53 = vmul.f32 1.4453057, %v3997_v27  ;;  %v720_v2 = vmul.f32 1.4453057, %v3999_v28  ;;  %v4558_v60 = vrot.slane %v934_v3, %v4007_v31 }
 0x11a   : > { %v721_v0 = vmul.f32 1.4453057, %v4001_v29  ;;  %v5107_v22 = vld [vmem:[#allocation61_spill] sm:$0xff]  ;;  %v731_v24 = vrot.slane %v5108_v21, 6  ;;  %v732_v25 = vrot.slane %v5109_v35, 6  ;;  %v733_v26 = vrot.slane %v5110_v8, 6 }
 0x11b   : > { %v730_v23 = vrot.slane %v5107_v22, 6  ;;  %v734_v47 = vrot.slane %v5111_v4, 6  ;;  %v735_v55 = vrot.slane %v5112_v49, 6  ;;  %v5113_v27 = vld [vmem:[#allocation67_spill] sm:$0xff]  ;;  %v5114_v28 = vld [vmem:[#allocation68_spill] sm:$0xff]  ;;  %v754_v1 = vsub.f32 0.0, %v4005_v30 }
 0x11c   : > { %v736_v9 = vrot.slane %v5113_v27, 6  ;;  %v737_v19 = vrot.slane %v5114_v28, 6  ;;  %v4570_v3 = vmul.f32 %v731_v24, %v715_v38  ;;  %v4572_v17 = vmul.f32 %v732_v25, %v716_v40 }
 0x11d   : > { %v4568_v29 = vmul.f32 %v730_v23, %v714_v5  ;;  %v4574_v20 = vmul.f32 %v733_v26, %v717_v41  ;;  %v4576_v33 = vmul.f32 %v734_v47, %v718_v13  ;;  %v4578_v62 = vmul.f32 %v735_v55, %v719_v53 }
 0x11e   : > { %v4580_v50 = vmul.f32 %v736_v9, %v720_v2  ;;  %v4582_v52 = vmul.f32 %v737_v19, %v721_v0  ;;  %v755_v11 = vsub.f32 0.0, %v4011_v32  ;;  %v756_v51 = vsub.f32 0.0, %v5090_v18  ;;  %v5115_v9 = vld [vmem:[#allocation77_spill] sm:$0xff]  ;;  %v5117_v19 = vld [vmem:[#allocation79_spill] sm:$0xff] }
 0x11f   : > { %v757_v5 = vsub.f32 0.0, %v5091_v34  ;;  %v758_v38 = vsub.f32 0.0, %v5092_v45  ;;  %v759_v40 = vsub.f32 0.0, %v5093_v36  ;;  %v760_v41 = vsub.f32 0.0, %v5094_v48 }
 0x120   : > { %v761_v13 = vsub.f32 0.0, %v4041_v44  ;;  %v762_v14 = vmul.f32 3.0, %v4005_v30  ;;  %v763_v15 = vmul.f32 3.0, %v4011_v32  ;;  %v764_v53 = vmul.f32 3.0, %v5090_v18 }
 0x121   : > { %v765_v2 = vmul.f32 3.0, %v5091_v34  ;;  %v766_v0 = vmul.f32 3.0, %v5092_v45  ;;  %v767_v22 = vmul.f32 3.0, %v5093_v36  ;;  %v768_v23 = vmul.f32 3.0, %v5094_v48 }
 0x122   : > { %v769_v21 = vmul.f32 3.0, %v4041_v44  ;;  %v778_v24 = vrot.slane %v762_v14, 1  ;;  %v779_v35 = vrot.slane %v763_v15, 1  ;;  %v780_v25 = vrot.slane %v764_v53, 1  ;;  %v5116_v44 = vld [vmem:[#allocation78_spill] sm:$0xff]  ;;  %v5118_v15 = vld [vmem:[#allocation80_spill] sm:$0xff] }
 0x123   : > { %v781_v8 = vrot.slane %v765_v2, 1  ;;  %v782_v26 = vrot.slane %v766_v0, 1  ;;  %v783_v30 = vrot.slane %v767_v22, 1  ;;  %v784_v4 = vrot.slane %v768_v23, 1  ;;  %v5123_v0 = vld [vmem:[#allocation26_spill] sm:$0xff]  ;;  %v5124_v22 = vld [vmem:[#allocation25_spill] sm:$0xff] }
 0x124   : > { %v785_v32 = vrot.slane %v769_v21, 1  ;;  %v794_v47 = vadd.f32 %v778_v24, %v754_v1  ;;  %v795_v18 = vadd.f32 %v779_v35, %v755_v11  ;;  %v796_v49 = vadd.f32 %v780_v25, %v756_v51  ;;  %v5119_v1 = vld [vmem:[#allocation81_spill] sm:$0xff]  ;;  %v5120_v51 = vld [vmem:[#allocation82_spill] sm:$0xff]  ;;  %v5125_v21 = vld [vmem:[#allocation28_spill] sm:$0xff] }
 0x125   : > { %v797_v34 = vadd.f32 %v781_v8, %v757_v5  ;;  %v798_v55 = vadd.f32 %v782_v26, %v758_v38  ;;  %v799_v45 = vadd.f32 %v783_v30, %v759_v40  ;;  %v800_v27 = vadd.f32 %v784_v4, %v760_v41  ;;  %v5121_v38 = vld [vmem:[#allocation83_spill] sm:$0xff]  ;;  %v5122_v41 = vld [vmem:[#allocation84_spill] sm:$0xff]  ;;  %v5128_v8 = vld [vmem:[#allocation30_spill] sm:$0xff] }
 0x126   : > { %v801_v36 = vadd.f32 %v785_v32, %v761_v13  ;;  %v4601_v48 = vmul.f32 %v794_v47, %v5115_v9  ;;  %v4604_v28 = vmul.f32 %v795_v18, %v5116_v44  ;;  %v4607_v14 = vmul.f32 %v796_v49, %v5117_v19  ;;  %v5126_v24 = vld [vmem:[#allocation27_spill] sm:$0xff]  ;;  %v5129_v30 = vld [vmem:[#allocation34_spill] sm:$0xff]  ;;  %v5130_v4 = vld [vmem:[#allocation32_spill] sm:$0xff] }
 0x127   : > { %v4610_v53 = vmul.f32 %v797_v34, %v5118_v15  ;;  %v4613_v11 = vmul.f32 %v798_v55, %v5119_v1  ;;  %v4616_v5 = vmul.f32 %v799_v45, %v5120_v51  ;;  %v4619_v40 = vmul.f32 %v800_v27, %v5121_v38  ;;  %v5127_v25 = vld [vmem:[#allocation31_spill] sm:$0xff]  ;;  %v5131_v47 = vld [vmem:[#allocation36_spill] sm:$0xff]  ;;  %v5134_v55 = vld [vmem:[#allocation38_spill] sm:$0xff] }
 0x128   : > { %v4622_v13 = vmul.f32 %v801_v36, %v5122_v41  ;;  %v949_v2 = vrot.slane %v935_v39, %v4007_v31  ;;  %v963_v23 = vcombine.low %v5124_v22, %v5123_v0  ;;  %v964_v35 = vcombine.low %v5126_v24, %v5125_v21  ;;  %v5132_v18 = vld [vmem:[#allocation35_spill] sm:$0xff]  ;;  %v5135_v27 = vld [vmem:[#allocation42_spill] sm:$0xff]  ;;  %v5136_v39 = vld [vmem:[#allocation40_spill] sm:$0xff] }
 0x129   : > { %v965_v26 = vcombine.low %v5128_v8, %v5127_v25  ;;  %v966_v32 = vcombine.low %v5130_v4, %v5129_v30  ;;  %v1024_v49 = vcombine.low %v5132_v18, %v5131_v47  ;;  %v5133_v34 = vld [vmem:[#allocation39_spill] sm:$0xff]  ;;  %v1026_v36 = vcombine.low %v5136_v39, %v5135_v27  ;;  %v5137_v51 = vld [vmem:[#allocation44_spill] sm:$0xff]  ;;  %v5144_v47 = vld [vmem:[#allocation49_spill] sm:$0xff] }
 0x12a   : > { %v1025_v45 = vcombine.low %v5134_v55, %v5133_v34  ;;  %v950_v9 = vcombine.low %v4558_v60, %v949_v2  ;;  %v973_v44 = vrot.slane %v963_v23, %v4007_v31  ;;  %v980_v19 = vrot.slane %v964_v35, %v4007_v31  ;;  %v5138_v38 = vld [vmem:[#allocation43_spill] sm:$0xff]  ;;  %v5139_v60 = vld [vmem:[#allocation46_spill] sm:$0xff]  ;;  %v5140_v2 = vld [vmem:[#allocation45_spill] sm:$0xff] }
 0x12b   : > { %v987_v15 = vrot.slane %v965_v26, %v4007_v31  ;;  %v994_v1 = vrot.slane %v966_v32, %v4007_v31  ;;  %v1027_v41 = vcombine.low %v5138_v38, %v5137_v51  ;;  %v1034_v0 = vrot.slane %v1024_v49, %v4007_v31  ;;  %v5141_v25 = vld [vmem:[#allocation48_spill] sm:$0xff]  ;;  %v5142_v35 = vld [vmem:[#allocation47_spill] sm:$0xff]  ;;  %v5143_v32 = vld [vmem:[#allocation50_spill] sm:$0xff] }
 0x12c   : > { %v1041_v22 = vrot.slane %v1025_v45, %v4007_v31  ;;  %953 = vst [vmem:[#allocation2 + $0x3] ss:$8 sm:$0xf] %v950_v9  ;;  %v995_v21 = vcombine.low %v973_v44, %v980_v19  ;;  %v1048_v24 = vrot.slane %v1026_v36, %v4007_v31  ;;  %v1085_v23 = vcombine.low %v5140_v2, %v5139_v60  ;;  %v5145_v34 = vld [vmem:[#allocation52_spill] sm:$0xff]  ;;  %v5146_v55 = vld [vmem:[#allocation51_spill] sm:$0xff]  ;;  %v5147_v51 = vld [vmem:[#allocation54_spill] sm:$0xff] }
 0x12d   : > { %v1086_v8 = vcombine.low %v5142_v35, %v5141_v25  ;;  %954 = vst [vmem:[#allocation2 + $0x3] ss:$8 sm:$0xf0] %v950_v9  ;;  %v996_v26 = vcombine.low %v987_v15, %v994_v1  ;;  %v1055_v30 = vrot.slane %v1027_v41, %v4007_v31  ;;  %v1087_v18 = vcombine.low %v5144_v47, %v5143_v32  ;;  %v5148_v38 = vld [vmem:[#allocation53_spill] sm:$0xff] }
 0x12e   : > { %v1056_v4 = vcombine.high %v1034_v0, %v1041_v22  ;;  %v1003_v49 = vrot.slane %v995_v21, %v4007_v31  ;;  %v1088_v45 = vcombine.low %v5146_v55, %v5145_v34  ;;  %v1095_v27 = vrot.slane %v1085_v23, %v4007_v31  ;;  %v5149_v0 = vld [vmem:[#allocation56_spill] sm:$0xff]  ;;  %v5150_v22 = vld [vmem:[#allocation55_spill] sm:$0xff]  ;;  %v5151_v23 = vld [vmem:[#allocation58_spill] sm:$0xff] }
 0x12f   : > { %v1102_v39 = vrot.slane %v1086_v8, %v4007_v31  ;;  %v1010_v36 = vrot.slane %v996_v26, %v4007_v31  ;;  %v1057_v44 = vcombine.high %v1048_v24, %v1055_v30  ;;  %v1109_v19 = vrot.slane %v1087_v18, %v4007_v31  ;;  %v5152_v25 = vld [vmem:[#allocation57_spill] sm:$0xff]  ;;  %v5153_v24 = vld [vmem:[#allocation60_spill] sm:$0xff]  ;;  %v5154_v8 = vld [vmem:[#allocation59_spill] sm:$0xff] }
 0x130   : > { %v1064_v9 = vrot.slane %v1056_v4, %v4007_v31  ;;  %v1116_v15 = vrot.slane %v1088_v45, %v4007_v31  ;;  %v1146_v41 = vcombine.low %v5148_v38, %v5147_v51  ;;  %v1147_v21 = vcombine.low %v5150_v22, %v5149_v0  ;;  %v5155_v55 = vld [vmem:[#allocation70_spill] sm:$0xff]  ;;  %v5156_v45 = vld [vmem:[#allocation69_spill] sm:$0xff]  ;;  %v5162_v0 = vld [vmem:[#allocation75_spill] sm:$0xff] }
 0x131   : > { %v1117_v1 = vcombine.low %v1095_v27, %v1102_v39  ;;  %v1011_v60 = vcombine.low %v1003_v49, %v1010_v36  ;;  %v1071_v2 = vrot.slane %v1057_v44, %v4007_v31  ;;  %v1148_v35 = vcombine.low %v5152_v25, %v5151_v23  ;;  %v5157_v44 = vld [vmem:[#allocation72_spill] sm:$0xff]  ;;  %v5160_v51 = vld [vmem:[#allocation73_spill] sm:$0xff] }
 0x132   : > { %v1149_v26 = vcombine.low %v5154_v8, %v5153_v24  ;;  %v1118_v30 = vcombine.low %v1109_v19, %v1116_v15  ;;  %v1156_v32 = vrot.slane %v1146_v41, %v4007_v31  ;;  %v1163_v47 = vrot.slane %v1147_v21, %v4007_v31  ;;  %v5158_v19 = vld [vmem:[#allocation71_spill] sm:$0xff]  ;;  %v5164_v23 = vld [vmem:[#allocation85_spill] sm:$0xff] }
 0x133   : > { %v1125_v4 = vrot.slane %v1117_v1, %v4007_v31  ;;  %1014 = vst [vmem:[#allocation2 + $0x4] ss:$8 sm:$0xf] %v1011_v60  ;;  %v1072_v18 = vcombine.low %v1064_v9, %v1071_v2  ;;  %v1170_v34 = vrot.slane %v1148_v35, %v4007_v31  ;;  %v1207_v27 = vcombine.low %v5156_v45, %v5155_v55  ;;  %v5159_v1 = vld [vmem:[#allocation74_spill] sm:$0xff]  ;;  %v5161_v9 = vld [vmem:[#allocation76_spill] sm:$0xff]  ;;  %v5168_v55 = vld [vmem:[#allocation89_spill] sm:$0xff] }
 0x134   : > { %v1177_v49 = vrot.slane %v1149_v26, %v4007_v31  ;;  %1015 = vst [vmem:[#allocation2 + $0x4] ss:$8 sm:$0xf0] %v1011_v60  ;;  %v1132_v39 = vrot.slane %v1118_v30, %v4007_v31  ;;  %v1178_v36 = vcombine.low %v1156_v32, %v1163_v47  ;;  %v1208_v15 = vcombine.low %v5158_v19, %v5157_v44  ;;  %v5163_v2 = vld [vmem:[#allocation86_spill] sm:$0xff]  ;;  %v5165_v32 = vld [vmem:[#allocation88_spill] sm:$0xff]  ;;  %v5166_v47 = vld [vmem:[#allocation87_spill] sm:$0xff] }
 0x135   : > { %v1209_v38 = vcombine.low %v5160_v51, %v5159_v1  ;;  %1075 = vst [vmem:[#allocation2 + $0x5] ss:$8 sm:$0xf] %v1072_v18  ;;  %v1210_v22 = vcombine.low %v5162_v0, %v5161_v9  ;;  %v1217_v21 = vrot.slane %v1207_v27, %v4007_v31  ;;  %v1268_v25 = vcombine.low %v5164_v23, %v5163_v2  ;;  %v5171_v44 = vld [vmem:[#allocation94_spill] sm:$0xff]  ;;  %v5172_v19 = vld [vmem:[#allocation93_spill] sm:$0xff] }
 0x136   : > { %v1179_v41 = vcombine.low %v1170_v34, %v1177_v49  ;;  %1076 = vst [vmem:[#allocation2 + $0x5] ss:$8 sm:$0xf0] %v1072_v18  ;;  %v1133_v60 = vcombine.high %v1125_v4, %v1132_v39  ;;  %v1186_v35 = vrot.slane %v1178_v36, %v4007_v31  ;;  %v1224_v24 = vrot.slane %v1208_v15, %v4007_v31  ;;  %v5167_v49 = vld [vmem:[#allocation90_spill] sm:$0xff]  ;;  %v5169_v18 = vld [vmem:[#allocation92_spill] sm:$0xff]  ;;  %v5170_v4 = vld [vmem:[#allocation91_spill] sm:$0xff] }
 0x137   : > { %v1231_v8 = vrot.slane %v1209_v38, %v4007_v31  ;;  %v1238_v30 = vrot.slane %v1210_v22, %v4007_v31  ;;  %v1269_v34 = vcombine.low %v5166_v47, %v5165_v32  ;;  %v1270_v45 = vcombine.low %v5168_v55, %v5167_v49  ;;  %v5173_v22 = vld [vmem:[#allocation96_spill] sm:$0xff]  ;;  %v5175_v23 = vld [vmem:[#allocation98_spill] sm:$0xff]  ;;  %v5179_v55 = vld [vmem:[#allocation21_spill] sm:$0xff] }
 0x138   : > { %v1193_v26 = vrot.slane %v1179_v41, %v4007_v31  ;;  %1136 = vst [vmem:[#allocation2 + $0x6] ss:$8 sm:$0xf] %v1133_v60  ;;  %v1239_v27 = vcombine.low %v1217_v21, %v1224_v24  ;;  %v1271_v39 = vcombine.low %v5170_v4, %v5169_v18  ;;  %v1278_v36 = vrot.slane %v1268_v25, %v4007_v31  ;;  %v5174_v21 = vld [vmem:[#allocation95_spill] sm:$0xff]  ;;  %v5176_v24 = vld [vmem:[#allocation97_spill] sm:$0xff] }
 0x139   : > { %v1329_v15 = vcombine.low %v5172_v19, %v5171_v44  ;;  %1137 = vst [vmem:[#allocation2 + $0x6] ss:$8 sm:$0xf0] %v1133_v60  ;;  %v1240_v51 = vcombine.low %v1231_v8, %v1238_v30  ;;  %v1285_v38 = vrot.slane %v1269_v34, %v4007_v31  ;;  %v1292_v41 = vrot.slane %v1270_v45, %v4007_v31  ;;  %v5178_v8 = vld [vmem:[#allocation99_spill] sm:$0xff]  ;;  %v5180_v45 = vld [vmem:[#allocation20_spill] sm:$0xff]  ;;  %v5182_v44 = vld [vmem:[#allocation22_spill] sm:$0xff] }
 0x13a   : > { %v1194_v1 = vcombine.low %v1186_v35, %v1193_v26  ;;  %v1247_v9 = vrot.slane %v1239_v27, %v4007_v31  ;;  %v1299_v0 = vrot.slane %v1271_v39, %v4007_v31  ;;  %v1330_v2 = vcombine.low %v5174_v21, %v5173_v22  ;;  %v5177_v35 = vld [vmem:[#allocation100_spill] sm:$0xff]  ;;  %v5186_v22 = vld [vmem:[#allocation102_spill] sm:$0xff] }
 0x13b   : > { %v1331_v25 = vcombine.low %v5176_v24, %v5175_v23  ;;  %v1254_v32 = vrot.slane %v1240_v51, %v4007_v31  ;;  %v1300_v60 = vcombine.high %v1278_v36, %v1285_v38  ;;  %v1332_v26 = vcombine.low %v5178_v8, %v5177_v35  ;;  %v5181_v36 = vld [vmem:[#allocation23_spill] sm:$0xff]  ;;  %v5184_v38 = vld [vmem:[#allocation24_spill] sm:$0xff] }
 0x13c   : > { %1197 = vst [vmem:[#allocation2 + $0x7] ss:$8 sm:$0xf] %v1194_v1  ;;  %v1339_v30 = vrot.slane %v1329_v15, %v4007_v31  ;;  %1198 = vst [vmem:[#allocation2 + $0x7] ss:$8 sm:$0xf0] %v1194_v1  ;;  %v1301_v47 = vcombine.high %v1292_v41, %v1299_v0  ;;  %v1346_v34 = vrot.slane %v1330_v2, %v4007_v31 }
 0x13d   : > { %v1353_v49 = vrot.slane %v1331_v25, %v4007_v31  ;;  %v1390_v27 = vcombine.low %v5180_v45, %v5179_v55  ;;  %v1255_v18 = vcombine.low %v1247_v9, %v1254_v32  ;;  %v1308_v4 = vrot.slane %v1300_v60, %v4007_v31  ;;  %v5183_v1 = vld [vmem:[#allocation101_spill] sm:$0xff]  ;;  %v5185_v0 = vld [vmem:[#allocation103_spill] sm:$0xff] }
 0x13e   : > { %v1360_v39 = vrot.slane %v1332_v26, %v4007_v31  ;;  %v1391_v19 = vcombine.low %v5182_v44, %v5181_v36  ;;  %v1315_v51 = vrot.slane %v1301_v47, %v4007_v31  ;;  %v1361_v15 = vcombine.low %v1339_v30, %v1346_v34 }
 0x13f   : > { %v1392_v41 = vcombine.low %v5184_v38, %v5183_v1  ;;  %v1393_v21 = vcombine.low %v5186_v22, %v5185_v0  ;;  %1258 = vst [vmem:[#allocation2 + $0x40] ss:$8 sm:$0xf] %v1255_v18  ;;  %v1400_v9 = vrot.slane %v1390_v27, %v4007_v31  ;;  %v1451_v24 = vcombine.low %v4507_v43, %v4509_v56 }
 0x140   : > { %v1362_v2 = vcombine.low %v1353_v49, %v1360_v39  ;;  %v1407_v23 = vrot.slane %v1391_v19, %v4007_v31  ;;  %1259 = vst [vmem:[#allocation2 + $0x40] ss:$8 sm:$0xf0] %v1255_v18  ;;  %v1316_v25 = vcombine.low %v1308_v4, %v1315_v51  ;;  %v1369_v32 = vrot.slane %v1361_v15, %v4007_v31 }
 0x141   : > { %v1414_v60 = vrot.slane %v1392_v41, %v4007_v31  ;;  %v1421_v35 = vrot.slane %v1393_v21, %v4007_v31  ;;  %v1452_v30 = vcombine.low %v4511_v6, %v4513_v54  ;;  %v1453_v47 = vcombine.low %v4515_v42, %v4517_v58 }
 0x142   : > { %v1376_v8 = vrot.slane %v1362_v2, %v4007_v31  ;;  %v1422_v26 = vcombine.high %v1400_v9, %v1407_v23  ;;  %1319 = vst [vmem:[#allocation2 + $0x41] ss:$8 sm:$0xf] %v1316_v25  ;;  %v1454_v43 = vcombine.low %v4519_v7, %v4521_v12  ;;  %v1461_v56 = vrot.slane %v1451_v24, %v4007_v31 }
 0x143   : > { %v1423_v34 = vcombine.high %v1414_v60, %v1421_v35  ;;  %v1512_v49 = vcombine.low %v4524_v10, %v4527_v37  ;;  %1320 = vst [vmem:[#allocation2 + $0x41] ss:$8 sm:$0xf0] %v1316_v25  ;;  %v1468_v27 = vrot.slane %v1452_v30, %v4007_v31  ;;  %v1475_v6 = vrot.slane %v1453_v47, %v4007_v31  ;;  %v1708_v25 = vld [vmem:[#allocation2 + $0x8] sm:$0xff]  ;;  %v1707_v60 = vld [vmem:[#allocation2] sm:$0xff]  ;;  %v1709_v35 = vld [vmem:[#allocation2 + $0x10] sm:$0xff] }
 0x144   : > { %v1377_v55 = vcombine.low %v1369_v32, %v1376_v8  ;;  %v1430_v45 = vrot.slane %v1422_v26, %v4007_v31  ;;  %v1482_v42 = vrot.slane %v1454_v43, %v4007_v31  ;;  %v1513_v58 = vcombine.low %v4530_v61, %v4533_v59  ;;  %v1710_v32 = vld [vmem:[#allocation2 + $0x18] sm:$0xff]  ;;  %v1712_v8 = vld [vmem:[#allocation2 + $0x28] sm:$0xff]  ;;  %v1711_v43 = vld [vmem:[#allocation2 + $0x20] sm:$0xff] }
 0x145   : > { %v1437_v54 = vrot.slane %v1423_v34, %v4007_v31  ;;  %v1514_v7 = vcombine.low %v4536_v57, %v4539_v63  ;;  %v1483_v12 = vcombine.low %v1461_v56, %v1468_v27  ;;  %v1515_v10 = vcombine.low %v4542_v46, %v4545_v16  ;;  %v1714_v26 = vld [vmem:[#allocation2 + $0x38] sm:$0xff] }
 0x146   : > { %1380 = vst [vmem:[#allocation2 + $0x42] ss:$8 sm:$0xf] %v1377_v55  ;;  %v1522_v37 = vrot.slane %v1512_v49, %v4007_v31  ;;  %v1573_v18 = vcombine.low %v4568_v29, %v4570_v3  ;;  %1381 = vst [vmem:[#allocation2 + $0x42] ss:$8 sm:$0xf0] %v1377_v55  ;;  %v1484_v39 = vcombine.low %v1475_v6, %v1482_v42 }
 0x147   : > { %v1438_v4 = vcombine.low %v1430_v45, %v1437_v54  ;;  %v1529_v36 = vrot.slane %v1513_v58, %v4007_v31  ;;  %v1536_v61 = vrot.slane %v1514_v7, %v4007_v31  ;;  %v1491_v59 = vrot.slane %v1483_v12, %v4007_v31  ;;  %v1690_v54 = vld [vmem:[%s3967_s28 + $0x8] sm:$0xff] }
 0x148   : > { %v1543_v57 = vrot.slane %v1515_v10, %v4007_v31  ;;  %v1574_v63 = vcombine.low %v4572_v17, %v4574_v20  ;;  %v1575_v46 = vcombine.low %v4576_v33, %v4578_v62  ;;  %v1498_v16 = vrot.slane %v1484_v39, %v4007_v31  ;;  %v1713_v10 = vld [vmem:[#allocation2 + $0x30] sm:$0xff]  ;;  %v1700_v39 = vld [vmem:[%s3967_s28 + $0x58] sm:$0xff] }
 0x149   : > { %1441 = vst [vmem:[#allocation2 + $0x43] ss:$8 sm:$0xf] %v1438_v4  ;;  %v1544_v29 = vcombine.low %v1522_v37, %v1529_v36  ;;  %v1576_v3 = vcombine.low %v4580_v50, %v4582_v52  ;;  %v1583_v44 = vrot.slane %v1573_v18, %v4007_v31  ;;  %1442 = vst [vmem:[#allocation2 + $0x43] ss:$8 sm:$0xf0] %v1438_v4 }
 0x14a   : > { %v1545_v19 = vcombine.low %v1536_v61, %v1543_v57  ;;  %v1590_v51 = vrot.slane %v1574_v63, %v4007_v31  ;;  %v1597_v15 = vrot.slane %v1575_v46, %v4007_v31  ;;  %v1634_v17 = vcombine.low %v4601_v48, %v4604_v28  ;;  %v1698_v18 = vld [vmem:[%s3967_s28 + $0x48] sm:$0xff]  ;;  %v1692_v4 = vld [vmem:[%s3967_s28 + $0x18] sm:$0xff]  ;;  %v1705_v36 = vld [vmem:[#allocation9] sm:$0xff] }
 0x14b   : > { %v1499_v20 = vcombine.high %v1491_v59, %v1498_v16  ;;  %v1552_v33 = vrot.slane %v1544_v29, %v4007_v31  ;;  %v1604_v62 = vrot.slane %v1576_v3, %v4007_v31  ;;  %v1635_v1 = vcombine.low %v4607_v14, %v4610_v53  ;;  %v1706_v46 = vld [vmem:[#allocation9 + $0x8] sm:$0xff]  ;;  %v1689_v16 = vld [vmem:[%s3967_s28] sm:$0xff]  ;;  %v1691_v3 = vld [vmem:[%s3967_s28 + $0x10] sm:$0xff] }
 0x14c   : > { %v1559_v50 = vrot.slane %v1545_v19, %v4007_v31  ;;  %v1605_v52 = vcombine.low %v1583_v44, %v1590_v51  ;;  %v1636_v38 = vcombine.low %v4613_v11, %v4616_v5  ;;  %v1637_v41 = vcombine.low %v4619_v40, %v4622_v13  ;;  %v1697_v29 = vld [vmem:[%s3967_s28 + $0x40] sm:$0xff]  ;;  %v1699_v44 = vld [vmem:[%s3967_s28 + $0x50] sm:$0xff]  ;;  %v1694_v19 = vld [vmem:[%s3967_s28 + $0x28] sm:$0xff] }
 0x14d   : > { %1502 = vst [vmem:[#allocation2 + $0x44] ss:$8 sm:$0xf] %v1499_v20  ;;  %v1606_v0 = vcombine.low %v1597_v15, %v1604_v62  ;;  %v1644_v48 = vrot.slane %v1634_v17, %v4007_v31  ;;  %v1651_v28 = vrot.slane %v1635_v1, %v4007_v31  ;;  %1503 = vst [vmem:[#allocation2 + $0x44] ss:$8 sm:$0xf0] %v1499_v20 }
 0x14e   : > { %v1560_v22 = vcombine.low %v1552_v33, %v1559_v50  ;;  %v1613_v21 = vrot.slane %v1605_v52, %v4007_v31  ;;  %v1658_v14 = vrot.slane %v1636_v38, %v4007_v31  ;;  %v1665_v53 = vrot.slane %v1637_v41, %v4007_v31  ;;  %v1702_v51 = vld [vmem:[%s3967_s28 + $0x68] sm:$0xff]  ;;  %v1696_v15 = vld [vmem:[%s3967_s28 + $0x38] sm:$0xff]  ;;  %v1693_v50 = vld [vmem:[%s3967_s28 + $0x20] sm:$0xff] }
 0x14f   : > { %v3700_v2 = vmov 0.0   ;;  %v1620_v11 = vrot.slane %v1606_v0, %v4007_v31  ;;  %v1666_v5 = vcombine.low %v1644_v48, %v1651_v28  ;;  %v3294_v57 = vpack.c.bf16 %v1698_v18, %v1690_v54  ;;  %v1704_v17 = vld [vmem:[%s3967_s28 + $0x78] sm:$0xff]  ;;  %v1701_v52 = vld [vmem:[%s3967_s28 + $0x60] sm:$0xff]  ;;  %v1695_v38 = vld [vmem:[%s3967_s28 + $0x30] sm:$0xff] }
 0x150   : > { %1794 = vmatprep.mubr.f32.mxu0 %v3700_v2  ;;  %1871 = vmatprep.mubr.f32.mxu1 %v3700_v2  ;;  %1563 = vst [vmem:[#allocation2 + $0x45] ss:$8 sm:$0xf] %v1560_v22  ;;  %v1667_v40 = vcombine.low %v1658_v14, %v1665_v53  ;;  %1564 = vst [vmem:[#allocation2 + $0x45] ss:$8 sm:$0xf0] %v1560_v22  ;;  %v3298_v63 = vpack.c.bf16 %v1700_v39, %v1692_v4 }
 0x151   : > { %v1621_v13 = vcombine.high %v1613_v21, %v1620_v11  ;;  %v1674_v9 = vrot.slane %v1666_v5, %v4007_v31  ;;  %v3296_v20 = vpack.c.bf16 %v1697_v29, %v1689_v16  ;;  %v3300_v33 = vpack.c.bf16 %v1699_v44, %v1691_v3  ;;  %v1703_v41 = vld [vmem:[%s3967_s28 + $0x70] sm:$0xff]  ;;  %v1687_v0 = vld [vmem:[#allocation8] sm:$0xff]  ;;  %v1688_v22 = vld [vmem:[#allocation8 + $0x8] sm:$0xff] }
 0x152   : > { %v1681_v23 = vrot.slane %v1667_v40, %v4007_v31  ;;  %v3302_v62 = vpack.c.bf16 %v1702_v51, %v1694_v19  ;;  %v3306_v1 = vpack.c.bf16 %v1704_v17, %v1696_v15  ;;  %v3304_v48 = vpack.c.bf16 %v1701_v52, %v1693_v50 }
 0x153   : > { %1624 = vst [vmem:[#allocation2 + $0x46] ss:$8 sm:$0xf] %v1621_v13  ;;  %1625 = vst [vmem:[#allocation2 + $0x46] ss:$8 sm:$0xf0] %v1621_v13  ;;  %v3308_v28 = vpack.c.bf16 %v1703_v41, %v1695_v38 }
 0x154   : > { %v1682_v24 = vcombine.low %v1674_v9, %v1681_v23 }
 0x156   : > { %1685 = vst [vmem:[#allocation2 + $0x47] ss:$8 sm:$0xf] %v1682_v24  ;;  %1686 = vst [vmem:[#allocation2 + $0x47] ss:$8 sm:$0xf0] %v1682_v24 }
 0x15d   : > { %v1716_v30 = vld [vmem:[#allocation2 + $0x48] sm:$0xff]  ;;  %v1718_v47 = vld [vmem:[#allocation2 + $0x58] sm:$0xff]  ;;  %v1715_v34 = vld [vmem:[#allocation2 + $0x40] sm:$0xff] }
 0x15e   : > { %v3278_v56 = vpack.c.bf16 %v1716_v30, %v1708_v25  ;;  %v3282_v49 = vpack.c.bf16 %v1718_v47, %v1710_v32  ;;  %v3280_v55 = vpack.c.bf16 %v1715_v34, %v1707_v60  ;;  %v1717_v45 = vld [vmem:[#allocation2 + $0x50] sm:$0xff]  ;;  %v1720_v27 = vld [vmem:[#allocation2 + $0x68] sm:$0xff]  ;;  %v1722_v6 = vld [vmem:[#allocation2 + $0x78] sm:$0xff] }
 0x15f   : > { %v3284_v42 = vpack.c.bf16 %v1717_v45, %v1709_v35  ;;  %v3286_v58 = vpack.c.bf16 %v1720_v27, %v1712_v8  ;;  %v3290_v7 = vpack.c.bf16 %v1722_v6, %v1714_v26  ;;  %v1719_v12 = vld [vmem:[#allocation2 + $0x60] sm:$0xff]  ;;  %v1721_v37 = vld [vmem:[#allocation2 + $0x70] sm:$0xff] }
 0x160   : > { %3279 = vmatprep.subr.bf16.mxu0 %v3278_v56  ;;  %3283 = vmatprep.subr.bf16.mxu1 %v3282_v49  ;;  %v3288_v61 = vpack.c.bf16 %v1719_v12, %v1711_v43  ;;  %v3292_v59 = vpack.c.bf16 %v1721_v37, %v1713_v10  ;;  %v2368_v27 = vld [vmem:[#allocation11] sm:$0xff] }
 0x161   : > { %3281 = vmatpush1.bf16.msra.mxu0 %v3280_v55  ;;  %3285 = vmatpush1.bf16.msra.mxu1 %v3284_v42 }
 0x162   : > { %3287 = vmatprep.subr.bf16.mxu0 %v3286_v58  ;;  %3291 = vmatprep.subr.bf16.mxu1 %v3290_v7 }
 0x164   : > { %3242 = vmatmul.mubr.msk.f32.vlgmr.msra.gmra.mrb[0].mxu0 %vm1723_vm0, %v1705_v36  ;;  %3244 = vmatmul.mubr.msk.f32.vlgmr.msra.gmra.mrb[0].mxu1 %vm1723_vm0, %v1705_v36 }
 0x165   : > { %1800 = vmatprep.mubr.f32.mxu0 %v3700_v2  ;;  %1877 = vmatprep.mubr.f32.mxu1 %v3700_v2 }
 0x166   : > { %3289 = vmatpush1.bf16.msra.mxu0 %v3288_v61  ;;  %3293 = vmatpush1.bf16.msra.mxu1 %v3292_v59 }
 0x167   : > { %3295 = vmatprep.subr.bf16.mxu0 %v3294_v57  ;;  %3299 = vmatprep.subr.bf16.mxu1 %v3298_v63  ;;  %v2369_v57 = vld [vmem:[#allocation11 + $0x8] sm:$0xff] }
 0x168   : > { %3243 = vmatmul.mubr.msk.f32.gmra.mrb[2].mxu0 %vm1723_vm0, %v1706_v46  ;;  %3245 = vmatmul.mubr.msk.f32.gmra.mrb[2].mxu1 %vm1723_vm0, %v1706_v46 }
 0x169   : > { %1948 = vmatprep.mubr.f32.mxu0 %v3700_v2  ;;  %2025 = vmatprep.mubr.f32.mxu1 %v3700_v2 }
 0x16c   : > { %3246 = vmatmul.mubr.msk.f32.vlgmr.msra.gmra.mrb[4].mxu0 %vm1723_vm0, %v1705_v36  ;;  %3248 = vmatmul.mubr.msk.f32.vlgmr.msra.gmra.mrb[4].mxu1 %vm1723_vm0, %v1705_v36 }
 0x16d   : > { %1954 = vmatprep.mubr.f32.mxu0 %v3700_v2  ;;  %2031 = vmatprep.mubr.f32.mxu1 %v3700_v2 }
 0x16e   : > { %3297 = vmatpush1.bf16.msra.mxu0 %v3296_v20  ;;  %3301 = vmatpush1.bf16.msra.mxu1 %v3300_v33 }
 0x16f   : > { %3303 = vmatprep.subr.bf16.mxu0 %v3302_v62  ;;  %3307 = vmatprep.subr.bf16.mxu1 %v3306_v1 }
 0x170   : > { %3247 = vmatmul.mubr.msk.f32.gmra.mrb[6].mxu0 %vm1723_vm0, %v1706_v46  ;;  %3249 = vmatmul.mubr.msk.f32.gmra.mrb[6].mxu1 %vm1723_vm0, %v1706_v46 }
 0x171   : > { %2108 = vmatprep.mubr.f32.mxu0 %v3700_v2  ;;  %2185 = vmatprep.mubr.f32.mxu1 %v3700_v2 }
 0x174   : > { %3250 = vmatmul.mubr.msk.f32.vlgmr.msra.gmra.mrb[0].mxu0 %vm1723_vm0, %v1687_v0  ;;  %3252 = vmatmul.mubr.msk.f32.vlgmr.msra.gmra.mrb[0].mxu1 %vm1723_vm0, %v1687_v0 }
 0x175   : > { %2114 = vmatprep.mubr.f32.mxu0 %v3700_v2  ;;  %2191 = vmatprep.mubr.f32.mxu1 %v3700_v2 }
 0x176   : > { %3305 = vmatpush1.bf16.msra.mxu0 %v3304_v48  ;;  %3309 = vmatpush1.bf16.msra.mxu1 %v3308_v28 }
 0x178   : > { %3251 = vmatmul.mubr.msk.f32.gmra.mrb[2].mxu0 %vm1723_vm0, %v1688_v22  ;;  %3253 = vmatmul.mubr.msk.f32.gmra.mrb[2].mxu1 %vm1723_vm0, %v1688_v22 }
 0x179   : > { %2262 = vmatprep.mubr.f32.mxu0 %v3700_v2  ;;  %2339 = vmatprep.mubr.f32.mxu1 %v3700_v2 }
 0x17c   : > { %3254 = vmatmul.mubr.msk.f32.vlgmr.msra.gmra.mrb[4].mxu0 %vm1723_vm0, %v1687_v0  ;;  %3256 = vmatmul.mubr.msk.f32.vlgmr.msra.gmra.mrb[4].mxu1 %vm1723_vm0, %v1687_v0 }
 0x17d   : > { %2268 = vmatprep.mubr.f32.mxu0 %v3700_v2  ;;  %2345 = vmatprep.mubr.f32.mxu1 %v3700_v2 }
 0x180   : > { %3255 = vmatmul.mubr.msk.f32.gmra.mrb[6].mxu0 %vm1723_vm0, %v1688_v22  ;;  %3257 = vmatmul.mubr.msk.f32.gmra.mrb[6].mxu1 %vm1723_vm0, %v1688_v22 }
 0x181   : > { %2440 = vmatprep.mubr.f32.mxu0 %v3700_v2  ;;  %2517 = vmatprep.mubr.f32.mxu1 %v3700_v2 }
 0x247   : > { %v2110_v21 = vpop.f32.mrb[0].mxu0  ;;  %v2187_v14 = vpop.f32.mrb[0].mxu1 }
 0x248   : > { %v2112_v53 = vpop.f32.mrb[1].mxu0  ;;  %v2189_v11 = vpop.f32.mrb[1].mxu1  ;;  %v2352_v13 = vmax.f32 %v2110_v21, 0.0  ;;  %v2354_v9 = vmax.f32 %v2187_v14, 0.0 }
 0x249   : > { %v2353_v60 = vmax.f32 %v2112_v53, 0.0  ;;  %v2355_v35 = vmax.f32 %v2189_v11, 0.0 }
 0x24b   : > { %v2116_v5 = vpop.f32.mrb[2].mxu0  ;;  %v2193_v40 = vpop.f32.mrb[2].mxu1 }
 0x24c   : > { %v2360_v23 = vmax.f32 %v2116_v5, 0.0  ;;  %v2362_v24 = vmax.f32 %v2193_v40, 0.0  ;;  %v2118_v25 = vpop.f32.mrb[3].mxu0  ;;  %v2195_v32 = vpop.f32.mrb[3].mxu1  ;;  %v2700_v5 = vld [vmem:[%s4929_s5] sm:$0xff] }
 0x24d   : > { %v2361_v8 = vmax.f32 %v2118_v25, 0.0  ;;  %v2363_v26 = vmax.f32 %v2195_v32, 0.0 }
 0x24e   : > { %v3312_v30 = vpack.c.bf16 %v2360_v23, %v2352_v13  ;;  %v3316_v47 = vpack.c.bf16 %v2362_v24, %v2354_v9 }
 0x24f   : > { %v3310_v34 = vpack.c.bf16 %v2361_v8, %v2353_v60  ;;  %v3314_v43 = vpack.c.bf16 %v2363_v26, %v2355_v35  ;;  %v2264_v56 = vpop.f32.mrb[4].mxu0  ;;  %v2341_v49 = vpop.f32.mrb[4].mxu1 }
 0x250   : > { %v2266_v55 = vpop.f32.mrb[5].mxu0  ;;  %v2343_v45 = vpop.f32.mrb[5].mxu1  ;;  %v2356_v42 = vmax.f32 %v2264_v56, 0.0  ;;  %v2358_v58 = vmax.f32 %v2341_v49, 0.0 }
 0x251   : > { %3311 = vmatprep.subr.bf16.mxu0 %v3310_v34  ;;  %3315 = vmatprep.subr.bf16.mxu1 %v3314_v43  ;;  %v2357_v18 = vmax.f32 %v2266_v55, 0.0  ;;  %v2359_v4 = vmax.f32 %v2343_v45, 0.0 }
 0x252   : > { %3313 = vmatpush1.bf16.msra.mxu0 %v3312_v30  ;;  %3317 = vmatpush1.bf16.msra.mxu1 %v3316_v47 }
 0x253   : > { %v2270_v6 = vpop.f32.mrb[6].mxu0  ;;  %v2347_v54 = vpop.f32.mrb[6].mxu1 }
 0x254   : > { %v2364_v7 = vmax.f32 %v2270_v6, 0.0  ;;  %v2366_v12 = vmax.f32 %v2347_v54, 0.0  ;;  %v2272_v10 = vpop.f32.mrb[7].mxu0  ;;  %v2349_v37 = vpop.f32.mrb[7].mxu1 }
 0x255   : > { %v2365_v39 = vmax.f32 %v2272_v10, 0.0  ;;  %v2367_v36 = vmax.f32 %v2349_v37, 0.0  ;;  %3258 = vmatmul.mubr.msk.f32.vlgmr.msra.gmra.mrb[8].mxu0 %vm1723_vm0, %v2368_v27  ;;  %3260 = vmatmul.mubr.msk.f32.vlgmr.msra.gmra.mrb[8].mxu1 %vm1723_vm0, %v2368_v27 }
 0x256   : > { %v3320_v61 = vpack.c.bf16 %v2364_v7, %v2356_v42  ;;  %v3324_v59 = vpack.c.bf16 %v2366_v12, %v2358_v58  ;;  %2446 = vmatprep.mubr.f32.mxu0 %v3700_v2  ;;  %2523 = vmatprep.mubr.f32.mxu1 %v3700_v2 }
 0x257   : > { %v3318_v63 = vpack.c.bf16 %v2365_v39, %v2357_v18  ;;  %v3322_v46 = vpack.c.bf16 %v2367_v36, %v2359_v4 }
 0x259   : > { %3259 = vmatmul.mubr.msk.f32.gmra.mrb[10].mxu0 %vm1723_vm0, %v2369_v57  ;;  %3261 = vmatmul.mubr.msk.f32.gmra.mrb[10].mxu1 %vm1723_vm0, %v2369_v57 }
 0x25a   : > { %3319 = vmatprep.subr.bf16.mxu0 %v3318_v63  ;;  %3323 = vmatprep.subr.bf16.mxu1 %v3322_v46 }
 0x25b   : > { %3321 = vmatpush1.bf16.msra.mxu0 %v3320_v61  ;;  %3325 = vmatpush1.bf16.msra.mxu1 %v3324_v59 }
 0x25c   : > { %2594 = vmatprep.mubr.f32.mxu0 %v3700_v2  ;;  %2671 = vmatprep.mubr.f32.mxu1 %v3700_v2 }
 0x25e   : > { %3262 = vmatmul.mubr.msk.f32.vlgmr.msra.gmra.mrb[12].mxu0 %vm1723_vm0, %v2368_v27  ;;  %3264 = vmatmul.mubr.msk.f32.vlgmr.msra.gmra.mrb[12].mxu1 %vm1723_vm0, %v2368_v27 }
 0x25f   : > { %2600 = vmatprep.mubr.f32.mxu0 %v3700_v2  ;;  %2677 = vmatprep.mubr.f32.mxu1 %v3700_v2 }
 0x262   : > { %3263 = vmatmul.mubr.msk.f32.gmra.mrb[14].mxu0 %vm1723_vm0, %v2369_v57  ;;  %3265 = vmatmul.mubr.msk.f32.gmra.mrb[14].mxu1 %vm1723_vm0, %v2369_v57 }
 0x263   : > { %2768 = vmatprep.mubr.f32.mxu0 %v3700_v2  ;;  %2839 = vmatprep.mubr.f32.mxu1 %v3700_v2 }
 0x328   : > { %v2442_v16 = vpop.f32.mrb[8].mxu0  ;;  %v2519_v29 = vpop.f32.mrb[8].mxu1 }
 0x329   : > { %v2444_v3 = vpop.f32.mrb[9].mxu0  ;;  %v2521_v44 = vpop.f32.mrb[9].mxu1  ;;  %v2684_v15 = vmax.f32 %v2442_v16, 0.0  ;;  %v2686_v17 = vmax.f32 %v2519_v29, 0.0 }
 0x32a   : > { %v2685_v50 = vmax.f32 %v2444_v3, 0.0  ;;  %v2687_v52 = vmax.f32 %v2521_v44, 0.0 }
 0x32c   : > { %v2448_v19 = vpop.f32.mrb[10].mxu0  ;;  %v2525_v51 = vpop.f32.mrb[10].mxu1 }
 0x32d   : > { %v2692_v20 = vmax.f32 %v2448_v19, 0.0  ;;  %v2694_v33 = vmax.f32 %v2525_v51, 0.0  ;;  %v2450_v62 = vpop.f32.mrb[11].mxu0  ;;  %v2527_v1 = vpop.f32.mrb[11].mxu1 }
 0x32e   : > { %v2693_v38 = vmax.f32 %v2450_v62, 0.0  ;;  %v2695_v41 = vmax.f32 %v2527_v1, 0.0 }
 0x32f   : > { %v3328_v0 = vpack.c.bf16 %v2692_v20, %v2684_v15  ;;  %v3332_v48 = vpack.c.bf16 %v2694_v33, %v2686_v17 }
 0x330   : > { %v3326_v28 = vpack.c.bf16 %v2693_v38, %v2685_v50  ;;  %v3330_v22 = vpack.c.bf16 %v2695_v41, %v2687_v52 }
 0x331   : > { %v2596_v21 = vpop.f32.mrb[12].mxu0  ;;  %v2673_v14 = vpop.f32.mrb[12].mxu1 }
 0x332   : > { %3327 = vmatprep.subr.bf16.mxu0 %v3326_v28  ;;  %3331 = vmatprep.subr.bf16.mxu1 %v3330_v22  ;;  %v2598_v53 = vpop.f32.mrb[13].mxu0  ;;  %v2675_v11 = vpop.f32.mrb[13].mxu1  ;;  %v2688_v9 = vmax.f32 %v2596_v21, 0.0  ;;  %v2690_v23 = vmax.f32 %v2673_v14, 0.0 }
 0x333   : > { %3329 = vmatpush1.bf16.msra.mxu0 %v3328_v0  ;;  %3333 = vmatpush1.bf16.msra.mxu1 %v3332_v48  ;;  %v2689_v35 = vmax.f32 %v2598_v53, 0.0  ;;  %v2691_v8 = vmax.f32 %v2675_v11, 0.0 }
 0x335   : > { %v2602_v40 = vpop.f32.mrb[14].mxu0  ;;  %v2679_v13 = vpop.f32.mrb[14].mxu1 }
 0x336   : > { %v2696_v24 = vmax.f32 %v2602_v40, 0.0  ;;  %v2698_v25 = vmax.f32 %v2679_v13, 0.0  ;;  %v2604_v32 = vpop.f32.mrb[15].mxu0  ;;  %v2681_v60 = vpop.f32.mrb[15].mxu1  ;;  %3266 = vmatmul.mubr.msk.f32.vlgmr.msra.gmra.mrb[16].mxu0 %vm1723_vm0, %v2700_v5  ;;  %3267 = vmatmul.mubr.msk.f32.vlgmr.msra.gmra.mrb[16].mxu1 %vm1723_vm0, %v2700_v5 }
 0x337   : > { %v2697_v26 = vmax.f32 %v2604_v32, 0.0  ;;  %v2699_v30 = vmax.f32 %v2681_v60, 0.0  ;;  %2910 = vmatprep.mubr.f32.mxu0 %v3700_v2  ;;  %2981 = vmatprep.mubr.f32.mxu1 %v3700_v2 }
 0x338   : > { %v3336_v47 = vpack.c.bf16 %v2696_v24, %v2688_v9  ;;  %v3340_v34 = vpack.c.bf16 %v2698_v25, %v2690_v23 }
 0x339   : > { %v3334_v43 = vpack.c.bf16 %v2697_v26, %v2689_v35  ;;  %v3338_v56 = vpack.c.bf16 %v2699_v30, %v2691_v8 }
 0x33b   : > { %3335 = vmatprep.subr.bf16.mxu0 %v3334_v43  ;;  %3339 = vmatprep.subr.bf16.mxu1 %v3338_v56 }
 0x33c   : > { %3337 = vmatpush1.bf16.msra.mxu0 %v3336_v47  ;;  %3341 = vmatpush1.bf16.msra.mxu1 %v3340_v34 }
 0x33f   : > { %3268 = vmatmul.mubr.msk.f32.vlgmr.msra.gmra.mrb[18].mxu0 %vm1723_vm0, %v2700_v5  ;;  %3269 = vmatmul.mubr.msk.f32.vlgmr.msra.gmra.mrb[18].mxu1 %vm1723_vm0, %v2700_v5 }
 0x409   : > { %v2770_v49 = vpop.f32.mrb[16].mxu0  ;;  %v2841_v55 = vpop.f32.mrb[16].mxu1 }
 0x40a   : > { %v2988_v45 = vmul.f32 1.442695, %v2770_v49  ;;  %v2992_v27 = vmul.f32 1.442695, %v2841_v55  ;;  %v2772_v6 = vpop.f32.mrb[17].mxu0  ;;  %v2843_v54 = vpop.f32.mrb[17].mxu1 }
 0x40b   : > { %v2990_v42 = vmul.f32 1.442695, %v2772_v6  ;;  %v2994_v2 = vmul.f32 1.442695, %v2843_v54 }
 0x40c   : > { %3448 = vpow2.f32 %v2988_v45 }
 0x40d   : > { %3450 = vpow2.f32 %v2992_v27 }
 0x40e   : > { %3452 = vpow2.f32 %v2990_v42 }
 0x40f   : > { %3454 = vpow2.f32 %v2994_v2 }
 0x412   : > { %v2912_v58 = vpop.f32.mrb[18].mxu0  ;;  %v2983_v7 = vpop.f32.mrb[18].mxu1 }
 0x413   : > { %v2996_v12 = vmul.f32 1.442695, %v2912_v58  ;;  %v3000_v10 = vmul.f32 1.442695, %v2983_v7  ;;  %v2914_v37 = vpop.f32.mrb[19].mxu0  ;;  %v2985_v18 = vpop.f32.mrb[19].mxu1 }
 0x414   : > { %v2998_v4 = vmul.f32 1.442695, %v2914_v37  ;;  %v3002_v39 = vmul.f32 1.442695, %v2985_v18 }
 0x415   : > { %3456 = vpow2.f32 %v2996_v12 }
 0x416   : > { %v3449_v36 = vpop.eup %3448  ;;  %3458 = vpow2.f32 %v3000_v10 }
 0x417   : > { %v3451_v61 = vpop.eup %3450  ;;  %3460 = vpow2.f32 %v2998_v4 }
 0x418   : > { %v3453_v59 = vpop.eup %3452  ;;  %3462 = vpow2.f32 %v3002_v39 }
 0x419   : > { %v3455_v57 = vpop.eup %3454  ;;  %v3012_v63 = vcombine.low %v3449_v36, %v3453_v59 }
 0x41a   : > { %v3013_v46 = vcombine.low %v3451_v61, %v3455_v57 }
 0x41b   : > { %v3022_v16 = vrot.slane %v3012_v63, %v4007_v31 }
 0x41c   : > { %v3029_v29 = vrot.slane %v3013_v46, %v4007_v31 }
 0x41e   : > { %v3044_v3 = vcombine.low %v3022_v16, %v3029_v29 }
 0x41f   : > { %v3457_v44 = vpop.eup %3456 }
 0x420   : > { %v3459_v19 = vpop.eup %3458  ;;  %v3052_v50 = vrot.slane %v3044_v3, %v4007_v31 }
 0x421   : > { %v3461_v51 = vpop.eup %3460 }
 0x422   : > { %v3463_v15 = vpop.eup %3462  ;;  %v3014_v17 = vcombine.low %v3457_v44, %v3461_v51 }
 0x423   : > { %v3015_v20 = vcombine.low %v3459_v19, %v3463_v15 }
 0x424   : > { %v3036_v33 = vrot.slane %v3014_v17, %v4007_v31 }
 0x425   : > { %v3043_v62 = vrot.slane %v3015_v20, %v4007_v31 }
 0x427   : > { %v3045_v1 = vcombine.low %v3036_v33, %v3043_v62 }
 0x429   : > { %v3059_v52 = vrot.slane %v3045_v1, %v4007_v31 }
 0x42b   : > { %v3060_v38 = vcombine.low %v3052_v50, %v3059_v52 }
 0x42d   : > { %3062 = vst [vmem:[%s350_s14] sm:$0xff] %v3060_v38 }
 0x42e   : > { %3621 = shalt.err (!%p3618_p10)
}
 0x42f   : > { %s3622_s3 = scalar_lea.hbm %s4880_s30, 128  ;;  %s3626_s0 = scalar_lea.hbm %s4930_s6, 256 }
 0x430   : > { %p3623_p7 = scmp.ne.s32.totalorder %s4880_s30, %s3622_s3  ;;  %p3627_p1 = scmp.lt.u32.totalorder %s4880_s30, %s4930_s6 }
 0x431   : > { %p3628_p4 = scmp.lt.u32.totalorder %s3626_s0, %s3622_s3  ;;  %p3630_p2 = scmp.lt.u32.totalorder %s3622_s3, %s4880_s30 }
 0x432   : > { %p3624_p3 = pnand %p3623_p7, %p5187_p5 }
 0x433   : > { %p3629_p0 = por %p3628_p4, %p3627_p1 }
 0x434   : > { %p3625_p8 = pneg %p3624_p3 }
 0x435   : > { %p3631_p11 = por %p3630_p2, %p3629_p0 }
 0x437   : > { %p3632_p12 = pnand %p3631_p11, %p3625_p8 }
 0x439   : > { %3635 = shalt.err (!%p3632_p12)
}
 0x43a   : > { %3374 = dma.vmem_to_hbm [thread:$0]  (%p5187_p5), %s4882_s15, 128, %s4880_s30, %s3064_s2  }
 0x43b PF: > { %s3090_s13 = sand.u32 1, %s3674_s21   ;;  %p5188_p6 = scmp.ne.s32.totalorder %s4984_s10, 0 }
 0x43c   : > { %p5189_p13 = scmp.ge.s32.totalorder %s3686_s24, 2  ;;  %s3091_s8 = scalar_lea.sflag [#allocation5], %s3090_s13 }
 0x43e   : > { %p3394_p9 = pnand %p5189_p13, %p5188_p6 }
 0x440   : > { %3669 = dma.done.wait (!%p3394_p9), %s3091_s8, 128  }
 0x441   : > { %3671 = vsyncadd (!%p3394_p9), %s3091_s8, 4294967168  ;;  %s5190_s24 = sld [smem:[#allocation18_spill]]  ;;  %s5191_s7 = sld [smem:[#allocation19_spill]] }
 0x442   : > { %s5192_s21 = smov %s3678_s22  ;;  %s5193_s22 = smov %s3682_s23 }
 0x447   : > { %p23_p10 = scmp.ge.s32.totalorder %s5190_s24, 4   ;;  %s5194_s23 = smov %s5191_s7 }
 0x449   :  { %25 = sbr.rel (!%p23_p10) target bundleno = 12 (0xc), region = 129 }
 0x450   :  { %3096 = vsyncpa [#allocation4], 1 }
 0x451   :  { %3098 = vsyncpa [#allocation4 + $0x1], 1 }
 0x452   :  { %3099 = vsyncpa [#allocation7], 1 }
 0x453   :  { %3101 = vsyncpa [#allocation7 + $0x1], 1 }
 0x454   :  { %3102 = vsyncpa [#allocation10], 1 }
 0x455   :  { %3103 = vsyncpa [#allocation5], 1 }
 0x456   :  { %3105 = vsyncpa [#allocation5 + $0x1], 1 }

</bundles_post_ra>
